<compile_context>
chip_gen: v5e
topology: v5e:2x2
jax: 0.10.0
libtpu: 0.0.40
codegen_flags: <defaults>
</compile_context>

<pallas_src>
import jax
import jax.numpy as jnp
import numpy as np
from jax.experimental import pallas as pl
from jax.experimental.pallas import tpu as pltpu

EPS = 1e-5          # InstanceNorm2d default eps (affine=False, no running stats)
NEG_SLOPE = 0.01    # LeakyReLU default negative_slope

# ConvTranspose2d(k=4, s=2, p=1): output row 2i+py gets contributions from
# (padded-input row offset oy, kernel row kh):
#   py=0 : (oy=0, kh=3), (oy=1, kh=1)      py=1 : (oy=1, kh=2), (oy=2, kh=0)
TAPS = {0: ((0, 3), (1, 1)), 1: ((1, 2), (2, 0))}

# For parity p = 2*py + px: the 4 (row, col) patch origins in the padded input,
# ordered exactly like the folded weight rows below.
PATCH_OFFSETS = [
    [(oy, ox) for (oy, _) in TAPS[py] for (ox, _) in TAPS[px]]
    for py in (0, 1) for px in (0, 1)
]


def make_unet_up_kernel(NB, H, W, Cin, Ct, lane_store):
    """Kernel for one (batch-tile, Cout-tile) block.

    xp_ref : (NB, H+2, W+2, Cin)   zero-padded channels-last input tile
    w_ref  : (4, 4*Cin, Ct)        per-parity tap-folded weights
    o_ref  : (NB, H*W, 4*Ct)       parity-folded (lane order = (parity, channel)) output
    """
    M = NB * H * W
    count = float(4 * H * W)   # InstanceNorm reduces over the full 2H x 2W map

    def kernel(xp_ref, w_ref, o_ref):
        xp = xp_ref[...]                                        # (NB, H+2, W+2, Cin)

        # Only the 3 W (sublane) shifts are real repacks; everything else is an
        # H slice (outside the last two dims) + leading-dim reshape, which is a
        # pure layout reinterpretation when W % 8 == 0.
        xs = [xp[:, :, ox:ox + W, :] for ox in range(3)]        # (NB, H+2, W, Cin)

        patches = {}
        for p in range(4):
            for off in PATCH_OFFSETS[p]:
                if off not in patches:
                    oy, ox = off
                    patches[off] = xs[ox][:, oy:oy + H, :, :].reshape(M, Cin)

        accs = []
        sum_ = None
        sqsum = None
        for p in range(4):
            # Fold the 4 taps of this parity into a single matmul with K = 4*Cin.
            a_p = jnp.concatenate([patches[off] for off in PATCH_OFFSETS[p]],
                                  axis=-1)                       # (M, 4*Cin)
            acc = jnp.dot(a_p, w_ref[p],
                          preferred_element_type=jnp.float32)    # (M, Ct), f32
            acc = acc.reshape(NB, H * W, Ct)
            accs.append(acc)

            # Fused InstanceNorm statistics (per image, per channel), kept in f32.
            s = jnp.sum(acc, axis=1, keepdims=True)              # (NB, 1, Ct)
            q = jnp.sum(acc * acc, axis=1, keepdims=True)        # (NB, 1, Ct)
            sum_ = s if sum_ is None else sum_ + s
            sqsum = q if sqsum is None else sqsum + q

        mean = sum_ / count
        var = jnp.maximum(sqsum / count - mean * mean, 0.0)      # biased variance
        inv = jax.lax.rsqrt(var + EPS)

        if lane_store:
            # Ct % 128 == 0: four 128-aligned lane-slice stores (unmasked vst),
            # no concat buffer, fewer live (M, Ct) arrays.
            for p, acc in enumerate(accs):
                yn = (acc - mean) * inv
                act = jnp.maximum(yn, NEG_SLOPE * yn)            # LeakyReLU(0.01)
                o_ref[:, :, p * Ct:(p + 1) * Ct] = act.astype(o_ref.dtype)
        else:
            # Tiny shapes (4*Ct < 128): keep the single lane-dense store.
            acts = []
            for acc in accs:
                yn = (acc - mean) * inv
                acts.append(jnp.maximum(yn, NEG_SLOPE * yn))
            o_ref[...] = jnp.concatenate(acts, axis=-1).astype(o_ref.dtype)

    return kernel


def unet_up_forward(x_nchw, skip_nchw, weight, *,
                    batch_tile=None, cout_tile=None,
                    compute_dtype=jnp.bfloat16,
                    vmem_budget_bytes=44 << 20):
    """x: (N, Cin, H, W), skip: (N, Cskip, 2H, 2W), weight: (Cin, Cout, 4, 4) (torch layout).
    Returns (N, Cout + Cskip, 2H, 2W), matching UNetUp.forward (dropout=0.0).

    batch_tile   : images per grid step (default: N//2 when possible, so v7x's two
                   TensorCores both get work; auto-shrunk further to fit VMEM).
    cout_tile    : Cout channels per grid step (default: all, auto-shrunk to fit VMEM).
                   Partial tiles require cout_tile % 128 == 0.
    compute_dtype: MXU operand dtype (default bf16; accumulation and InstanceNorm
                   statistics stay f32).  Pass jnp.float32 for the exact-f32 path.
    """
    N, Cin, H, W = x_nchw.shape
    Cout = weight.shape[1]
    out_dtype = x_nchw.dtype
    bc = jnp.dtype(compute_dtype).itemsize if compute_dtype is not None \
        else jnp.dtype(out_dtype).itemsize
    bo = jnp.dtype(out_dtype).itemsize

    def vmem_estimate(nb, ct):
        """Rough peak VMEM: 2x double-buffered BlockSpec blocks + in-kernel temps."""
        m = nb * H * W
        xp_blk = nb * (H + 2) * (W + 2) * Cin * bc
        w_blk = 16 * Cin * ct * bc
        out_blk = m * 4 * ct * bo
        xs = 3 * nb * (H + 2) * W * Cin * bc          # 3 W-shifted copies
        a_p = 2 * m * 4 * Cin * bc                    # folded dot operand (+ slack)
        accs = 4 * m * ct * 4                         # f32 accumulators
        epi = 2 * m * ct * 4                          # normalize / store staging
        return 2 * (xp_blk + w_blk + out_blk) + xs + a_p + accs + epi

    # --- tile selection -------------------------------------------------------
    if batch_tile is not None:
        NB = batch_tile
        assert N % NB == 0, "batch_tile must divide N"
    else:
        # >= 2 grid steps by default so v7x's second TensorCore is used.
        NB = N // 2 if (N % 2 == 0 and N > 1) else N
        while vmem_estimate(NB, Cout) > vmem_budget_bytes and NB % 2 == 0 and NB > 1:
            NB //= 2

    ct = Cout if cout_tile is None else cout_tile
    assert Cout % ct == 0, "cout_tile must divide Cout"
    if ct != Cout:
        assert ct % 128 == 0, "partial Cout tiles require cout_tile % 128 == 0"
    if cout_tile is None:
        # Shrink Cout tile only after the batch tile; keep ct a multiple of 128
        # (multiples of 256 preferred on v6e -- the loop stops at 128 minimum).
        while (vmem_estimate(NB, ct) > vmem_budget_bytes
               and ct % 2 == 0 and (ct // 2) % 128 == 0 and ct > 128):
            ct //= 2

    est = vmem_estimate(NB, ct)
    # Always pass an explicit scoped-VMEM limit (defaults are only 16/32 MiB);
    # clamp to a value that is safe on v5e/v6e (128 MiB) and v7x (64 MiB) alike.
    vmem_limit_bytes = int(min(48 << 20, max(32 << 20, int(1.25 * est))))

    lane_store = (ct % 128 == 0)

    # --- glue (input side): NCHW -> channels-last, zero-pad spatially by 1 ----
    x_nhwc = jnp.transpose(x_nchw, (0, 2, 3, 1))
    xp = jnp.pad(x_nhwc, ((0, 0), (1, 1), (1, 1), (0, 0)))

    # Fold the 4 taps of each output parity into one (4*Cin, Cout) weight matrix
    # (tiny tensor, done once in the wrapper).  Row order matches PATCH_OFFSETS.
    w_k = jnp.transpose(weight, (2, 3, 0, 1))                    # (kh, kw, Cin, Cout)
    w_fold = jnp.stack(
        [jnp.concatenate([w_k[kh, kw] for (_, kh) in TAPS[py] for (_, kw) in TAPS[px]],
                         axis=0)
         for py in (0, 1) for px in (0, 1)],
        axis=0)                                                  # (4, 4*Cin, Cout)

    if compute_dtype is not None:
        xp = xp.astype(compute_dtype)
        w_fold = w_fold.astype(compute_dtype)

    grid = (N // NB, Cout // ct)

    # NOTE: the weight block is small and constant along the batch grid axis; it
    # could additionally be single-buffered (pipeline_mode=pl.Buffered(1)) to free
    # 16*Cin*ct*bytes of double-buffer headroom on VMEM-tight v7x configurations.
    out = pl.pallas_call(
        make_unet_up_kernel(NB, H, W, Cin, ct, lane_store),
        out_shape=jax.ShapeDtypeStruct((N, H * W, 4 * Cout), out_dtype),
        grid_spec=pltpu.PrefetchScalarGridSpec(
            num_scalar_prefetch=0,
            grid=grid,
            in_specs=[
                pl.BlockSpec((NB, H + 2, W + 2, Cin), lambda n, c: (n, 0, 0, 0)),
                pl.BlockSpec((4, 4 * Cin, ct), lambda n, c: (0, 0, c)),
            ],
            out_specs=pl.BlockSpec((NB, H * W, 4 * ct), lambda n, c: (n, 0, c)),
        ),
        compiler_params=pltpu.CompilerParams(
            dimension_semantics=("parallel", "parallel"),
            vmem_limit_bytes=vmem_limit_bytes),
    )(xp, w_fold)

    # --- glue (output side): un-fold lanes (cout_block, py, px, cout_in) back to
    # NCHW with a single transpose, then channel-concat with skip (module semantics).
    n_cb = Cout // ct
    y = out.reshape(N, H, W, n_cb, 2, 2, ct)        # (N, i, j, cb, py, px, ci)
    y = y.transpose(0, 3, 6, 1, 4, 2, 5)            # (N, cb, ci, i, py, j, px)
    y = y.reshape(N, Cout, 2 * H, 2 * W)            # NCHW
    return jnp.concatenate([y, skip_nchw], axis=1)


def ref_forward(x, skip, weight):
    """Pure-JAX reference matching PyTorch UNetUp.forward (dropout=0.0)."""
    w_flip = weight[:, :, ::-1, ::-1]
    w_oihw = jnp.transpose(w_flip, (1, 0, 2, 3))
    y = jax.lax.conv_general_dilated(
        x, w_oihw, window_strides=(1, 1), padding=((2, 2), (2, 2)),
        lhs_dilation=(2, 2), dimension_numbers=("NCHW", "OIHW", "NCHW"))
    mean = y.mean(axis=(2, 3), keepdims=True)
    var = ((y - mean) ** 2).mean(axis=(2, 3), keepdims=True)
    yn = (y - mean) / jnp.sqrt(var + EPS)
    act = jnp.where(yn >= 0, yn, NEG_SLOPE * yn)
    return jnp.concatenate([act, skip], axis=1)


if __name__ == "__main__":
    key = jax.random.PRNGKey(0)

    # ---- Test A: module-spec demo shapes (tiny; concat-store path) -----------
    N, Cin, Cout, Cskip, H, W = 2, 8, 4, 4, 8, 8
    k1, k2, k3 = jax.random.split(key, 3)
    x = jax.random.normal(k1, (N, Cin, H, W), jnp.float32)
    skip = jax.random.normal(k2, (N, Cskip, 2 * H, 2 * W), jnp.float32)
    weight = 0.1 * jax.random.normal(k3, (Cin, Cout, 4, 4), jnp.float32)  # torch (Cin,Cout,4,4)
    ref = ref_forward(x, skip, weight)

    # default path: bf16 MXU operands, f32 accumulation + f32 InstanceNorm stats
    out = jax.block_until_ready(unet_up_forward(x, skip, weight))
    assert out.shape == (N, Cout + Cskip, 2 * H, 2 * W), out.shape
    np.testing.assert_allclose(np.asarray(out), np.asarray(ref), rtol=0.1, atol=0.1)

    # exact-f32 path
    out_f32 = jax.block_until_ready(
        unet_up_forward(x, skip, weight, compute_dtype=jnp.float32))
    np.testing.assert_allclose(np.asarray(out_f32), np.asarray(ref), rtol=2e-3, atol=2e-3)

    # ---- Test B: performance path (Cout tiling + 128-aligned lane-slice stores) ----
    N2, Cin2, Cout2, Cskip2, H2, W2 = 2, 16, 256, 8, 4, 4
    k4, k5, k6 = jax.random.split(jax.random.PRNGKey(1), 3)
    x2 = jax.random.normal(k4, (N2, Cin2, H2, W2), jnp.float32)
    skip2 = jax.random.normal(k5, (N2, Cskip2, 2 * H2, 2 * W2), jnp.float32)
    weight2 = 0.1 * jax.random.normal(k6, (Cin2, Cout2, 4, 4), jnp.float32)
    ref2 = ref_forward(x2, skip2, weight2)
    out2 = jax.block_until_ready(
        unet_up_forward(x2, skip2, weight2, cout_tile=128, compute_dtype=jnp.float32))
    assert out2.shape == (N2, Cout2 + Cskip2, 2 * H2, 2 * W2), out2.shape
    np.testing.assert_allclose(np.asarray(out2), np.asarray(ref2), rtol=2e-3, atol=2e-3)

    # TODO(synk): nn.Dropout is only added when dropout > 0; default (0.0) has no dropout layer.
    print("KERNEL_OK")
</pallas_src>

<mosaic_0001>
module attributes {stable_mosaic.version = 11 : i64} {
  func.func @kernel(%arg0: i32, %arg1: i32, %arg2: memref<1x10x10x8xbf16, #tpu.memory_space<vmem>>, %arg3: memref<4x32x4xbf16, #tpu.memory_space<vmem>>, %arg4: memref<1x64x16xf32, #tpu.memory_space<vmem>>) attributes {dimension_semantics = [#tpu.dimension_semantics<parallel>, #tpu.dimension_semantics<parallel>], iteration_bounds = array<i64: 2, 1>, scalar_prefetch = 0 : i64, scratch_operands = 0 : i64, tpu.core_type = #tpu.core_type<tc>, window_params = [{transform_indices = @transform_0, window_bounds = array<i64: 1, 10, 10, 8>}, {transform_indices = @transform_1, window_bounds = array<i64: 4, 32, 4>}, {transform_indices = @transform_2, window_bounds = array<i64: 1, 64, 16>}]} {
    %c0 = arith.constant 0 : index
    %c0_0 = arith.constant 0 : index
    %c0_1 = arith.constant 0 : index
    %c0_2 = arith.constant 0 : index
    %0 = vector.load %arg2[%c0, %c0_0, %c0_1, %c0_2] : memref<1x10x10x8xbf16, #tpu.memory_space<vmem>>, vector<1x10x10x8xbf16>
    %1 = vector.extract_strided_slice %0 {offsets = [0, 0, 0, 0], sizes = [1, 10, 8, 8], strides = [1, 1, 1, 1]} : vector<1x10x10x8xbf16> to vector<1x10x8x8xbf16>
    %2 = vector.extract_strided_slice %0 {offsets = [0, 0, 1, 0], sizes = [1, 10, 8, 8], strides = [1, 1, 1, 1]} : vector<1x10x10x8xbf16> to vector<1x10x8x8xbf16>
    %3 = vector.extract_strided_slice %0 {offsets = [0, 0, 2, 0], sizes = [1, 10, 8, 8], strides = [1, 1, 1, 1]} : vector<1x10x10x8xbf16> to vector<1x10x8x8xbf16>
    %4 = vector.extract_strided_slice %1 {offsets = [0, 0, 0, 0], sizes = [1, 8, 8, 8], strides = [1, 1, 1, 1]} : vector<1x10x8x8xbf16> to vector<1x8x8x8xbf16>
    %5 = vector.shape_cast %4 : vector<1x8x8x8xbf16> to vector<64x8xbf16>
    %6 = vector.extract_strided_slice %2 {offsets = [0, 0, 0, 0], sizes = [1, 8, 8, 8], strides = [1, 1, 1, 1]} : vector<1x10x8x8xbf16> to vector<1x8x8x8xbf16>
    %7 = vector.shape_cast %6 : vector<1x8x8x8xbf16> to vector<64x8xbf16>
    %8 = vector.extract_strided_slice %1 {offsets = [0, 1, 0, 0], sizes = [1, 8, 8, 8], strides = [1, 1, 1, 1]} : vector<1x10x8x8xbf16> to vector<1x8x8x8xbf16>
    %9 = vector.shape_cast %8 : vector<1x8x8x8xbf16> to vector<64x8xbf16>
    %10 = vector.extract_strided_slice %2 {offsets = [0, 1, 0, 0], sizes = [1, 8, 8, 8], strides = [1, 1, 1, 1]} : vector<1x10x8x8xbf16> to vector<1x8x8x8xbf16>
    %11 = vector.shape_cast %10 : vector<1x8x8x8xbf16> to vector<64x8xbf16>
    %12 = vector.extract_strided_slice %3 {offsets = [0, 0, 0, 0], sizes = [1, 8, 8, 8], strides = [1, 1, 1, 1]} : vector<1x10x8x8xbf16> to vector<1x8x8x8xbf16>
    %13 = vector.shape_cast %12 : vector<1x8x8x8xbf16> to vector<64x8xbf16>
    %14 = vector.extract_strided_slice %3 {offsets = [0, 1, 0, 0], sizes = [1, 8, 8, 8], strides = [1, 1, 1, 1]} : vector<1x10x8x8xbf16> to vector<1x8x8x8xbf16>
    %15 = vector.shape_cast %14 : vector<1x8x8x8xbf16> to vector<64x8xbf16>
    %16 = vector.extract_strided_slice %1 {offsets = [0, 2, 0, 0], sizes = [1, 8, 8, 8], strides = [1, 1, 1, 1]} : vector<1x10x8x8xbf16> to vector<1x8x8x8xbf16>
    %17 = vector.shape_cast %16 : vector<1x8x8x8xbf16> to vector<64x8xbf16>
    %18 = vector.extract_strided_slice %2 {offsets = [0, 2, 0, 0], sizes = [1, 8, 8, 8], strides = [1, 1, 1, 1]} : vector<1x10x8x8xbf16> to vector<1x8x8x8xbf16>
    %19 = vector.shape_cast %18 : vector<1x8x8x8xbf16> to vector<64x8xbf16>
    %20 = vector.extract_strided_slice %3 {offsets = [0, 2, 0, 0], sizes = [1, 8, 8, 8], strides = [1, 1, 1, 1]} : vector<1x10x8x8xbf16> to vector<1x8x8x8xbf16>
    %21 = vector.shape_cast %20 : vector<1x8x8x8xbf16> to vector<64x8xbf16>
    %22 = tpu.concatenate %5, %7, %9, %11 in 1 : vector<64x8xbf16>, vector<64x8xbf16>, vector<64x8xbf16>, vector<64x8xbf16> -> vector<64x32xbf16>
    %c0_3 = arith.constant 0 : index
    %c0_4 = arith.constant 0 : index
    %c0_5 = arith.constant 0 : index
    %23 = vector.load %arg3[%c0_3, %c0_4, %c0_5] : memref<4x32x4xbf16, #tpu.memory_space<vmem>>, vector<1x32x4xbf16>
    %24 = vector.shape_cast %23 : vector<1x32x4xbf16> to vector<32x4xbf16>
    %cst = arith.constant dense<0.000000e+00> : vector<64x4xf32>
    %25 = tpu.matmul %22, %24, %cst {dimension_numbers = #tpu.dot_dimension_numbers<[1], [0], [0], [1], [0, 0, 1, 1], [], []>} : vector<64x32xbf16>, vector<32x4xbf16>, vector<64x4xf32> -> vector<64x4xf32>
    %26 = vector.shape_cast %25 : vector<64x4xf32> to vector<1x64x4xf32>
    %cst_6 = arith.constant dense<0.000000e+00> : vector<1x4xf32>
    %27 = vector.multi_reduction <add>, %26, %cst_6 [1] : vector<1x64x4xf32> to vector<1x4xf32>
    %28 = vector.shape_cast %27 : vector<1x4xf32> to vector<1x1x4xf32>
    %29 = arith.mulf %26, %26 : vector<1x64x4xf32>
    %cst_7 = arith.constant dense<0.000000e+00> : vector<1x4xf32>
    %30 = vector.multi_reduction <add>, %29, %cst_7 [1] : vector<1x64x4xf32> to vector<1x4xf32>
    %31 = vector.shape_cast %30 : vector<1x4xf32> to vector<1x1x4xf32>
    %32 = tpu.concatenate %7, %13, %11, %15 in 1 : vector<64x8xbf16>, vector<64x8xbf16>, vector<64x8xbf16>, vector<64x8xbf16> -> vector<64x32xbf16>
    %c1 = arith.constant 1 : index
    %c0_8 = arith.constant 0 : index
    %c0_9 = arith.constant 0 : index
    %33 = vector.load %arg3[%c1, %c0_8, %c0_9] : memref<4x32x4xbf16, #tpu.memory_space<vmem>>, vector<1x32x4xbf16>
    %34 = vector.shape_cast %33 : vector<1x32x4xbf16> to vector<32x4xbf16>
    %cst_10 = arith.constant dense<0.000000e+00> : vector<64x4xf32>
    %35 = tpu.matmul %32, %34, %cst_10 {dimension_numbers = #tpu.dot_dimension_numbers<[1], [0], [0], [1], [0, 0, 1, 1], [], []>} : vector<64x32xbf16>, vector<32x4xbf16>, vector<64x4xf32> -> vector<64x4xf32>
    %36 = vector.shape_cast %35 : vector<64x4xf32> to vector<1x64x4xf32>
    %cst_11 = arith.constant dense<0.000000e+00> : vector<1x4xf32>
    %37 = vector.multi_reduction <add>, %36, %cst_11 [1] : vector<1x64x4xf32> to vector<1x4xf32>
    %38 = vector.shape_cast %37 : vector<1x4xf32> to vector<1x1x4xf32>
    %39 = arith.mulf %36, %36 : vector<1x64x4xf32>
    %cst_12 = arith.constant dense<0.000000e+00> : vector<1x4xf32>
    %40 = vector.multi_reduction <add>, %39, %cst_12 [1] : vector<1x64x4xf32> to vector<1x4xf32>
    %41 = vector.shape_cast %40 : vector<1x4xf32> to vector<1x1x4xf32>
    %42 = arith.addf %28, %38 : vector<1x1x4xf32>
    %43 = arith.addf %31, %41 : vector<1x1x4xf32>
    %44 = tpu.concatenate %9, %11, %17, %19 in 1 : vector<64x8xbf16>, vector<64x8xbf16>, vector<64x8xbf16>, vector<64x8xbf16> -> vector<64x32xbf16>
    %c2 = arith.constant 2 : index
    %c0_13 = arith.constant 0 : index
    %c0_14 = arith.constant 0 : index
    %45 = vector.load %arg3[%c2, %c0_13, %c0_14] : memref<4x32x4xbf16, #tpu.memory_space<vmem>>, vector<1x32x4xbf16>
    %46 = vector.shape_cast %45 : vector<1x32x4xbf16> to vector<32x4xbf16>
    %cst_15 = arith.constant dense<0.000000e+00> : vector<64x4xf32>
    %47 = tpu.matmul %44, %46, %cst_15 {dimension_numbers = #tpu.dot_dimension_numbers<[1], [0], [0], [1], [0, 0, 1, 1], [], []>} : vector<64x32xbf16>, vector<32x4xbf16>, vector<64x4xf32> -> vector<64x4xf32>
    %48 = vector.shape_cast %47 : vector<64x4xf32> to vector<1x64x4xf32>
    %cst_16 = arith.constant dense<0.000000e+00> : vector<1x4xf32>
    %49 = vector.multi_reduction <add>, %48, %cst_16 [1] : vector<1x64x4xf32> to vector<1x4xf32>
    %50 = vector.shape_cast %49 : vector<1x4xf32> to vector<1x1x4xf32>
    %51 = arith.mulf %48, %48 : vector<1x64x4xf32>
    %cst_17 = arith.constant dense<0.000000e+00> : vector<1x4xf32>
    %52 = vector.multi_reduction <add>, %51, %cst_17 [1] : vector<1x64x4xf32> to vector<1x4xf32>
    %53 = vector.shape_cast %52 : vector<1x4xf32> to vector<1x1x4xf32>
    %54 = arith.addf %42, %50 : vector<1x1x4xf32>
    %55 = arith.addf %43, %53 : vector<1x1x4xf32>
    %56 = tpu.concatenate %11, %15, %19, %21 in 1 : vector<64x8xbf16>, vector<64x8xbf16>, vector<64x8xbf16>, vector<64x8xbf16> -> vector<64x32xbf16>
    %c3 = arith.constant 3 : index
    %c0_18 = arith.constant 0 : index
    %c0_19 = arith.constant 0 : index
    %57 = vector.load %arg3[%c3, %c0_18, %c0_19] : memref<4x32x4xbf16, #tpu.memory_space<vmem>>, vector<1x32x4xbf16>
    %58 = vector.shape_cast %57 : vector<1x32x4xbf16> to vector<32x4xbf16>
    %cst_20 = arith.constant dense<0.000000e+00> : vector<64x4xf32>
    %59 = tpu.matmul %56, %58, %cst_20 {dimension_numbers = #tpu.dot_dimension_numbers<[1], [0], [0], [1], [0, 0, 1, 1], [], []>} : vector<64x32xbf16>, vector<32x4xbf16>, vector<64x4xf32> -> vector<64x4xf32>
    %60 = vector.shape_cast %59 : vector<64x4xf32> to vector<1x64x4xf32>
    %cst_21 = arith.constant dense<0.000000e+00> : vector<1x4xf32>
    %61 = vector.multi_reduction <add>, %60, %cst_21 [1] : vector<1x64x4xf32> to vector<1x4xf32>
    %62 = vector.shape_cast %61 : vector<1x4xf32> to vector<1x1x4xf32>
    %63 = arith.mulf %60, %60 : vector<1x64x4xf32>
    %cst_22 = arith.constant dense<0.000000e+00> : vector<1x4xf32>
    %64 = vector.multi_reduction <add>, %63, %cst_22 [1] : vector<1x64x4xf32> to vector<1x4xf32>
    %65 = vector.shape_cast %64 : vector<1x4xf32> to vector<1x1x4xf32>
    %66 = arith.addf %54, %62 : vector<1x1x4xf32>
    %67 = arith.addf %55, %65 : vector<1x1x4xf32>
    %cst_23 = arith.constant 2.560000e+02 : f32
    %68 = vector.broadcast %cst_23 : f32 to vector<1x1x4xf32>
    %69 = arith.divf %66, %68 : vector<1x1x4xf32>
    %cst_24 = arith.constant 2.560000e+02 : f32
    %70 = vector.broadcast %cst_24 : f32 to vector<1x1x4xf32>
    %71 = arith.divf %67, %70 : vector<1x1x4xf32>
    %72 = arith.mulf %69, %69 : vector<1x1x4xf32>
    %73 = arith.subf %71, %72 : vector<1x1x4xf32>
    %cst_25 = arith.constant 0.000000e+00 : f32
    %74 = vector.broadcast %cst_25 : f32 to vector<1x1x4xf32>
    %75 = arith.maximumf %73, %74 : vector<1x1x4xf32>
    %cst_26 = arith.constant 9.99999974E-6 : f32
    %76 = vector.broadcast %cst_26 : f32 to vector<1x1x4xf32>
    %77 = arith.addf %75, %76 : vector<1x1x4xf32>
    %78 = math.rsqrt %77 : vector<1x1x4xf32>
    %79 = vector.broadcast %69 : vector<1x1x4xf32> to vector<1x64x4xf32>
    %80 = arith.subf %26, %79 : vector<1x64x4xf32>
    %81 = vector.broadcast %78 : vector<1x1x4xf32> to vector<1x64x4xf32>
    %82 = arith.mulf %80, %81 : vector<1x64x4xf32>
    %cst_27 = arith.constant 0.00999999977 : f32
    %83 = vector.broadcast %cst_27 : f32 to vector<1x64x4xf32>
    %84 = arith.mulf %83, %82 : vector<1x64x4xf32>
    %85 = arith.maximumf %82, %84 : vector<1x64x4xf32>
    %86 = vector.broadcast %69 : vector<1x1x4xf32> to vector<1x64x4xf32>
    %87 = arith.subf %36, %86 : vector<1x64x4xf32>
    %88 = vector.broadcast %78 : vector<1x1x4xf32> to vector<1x64x4xf32>
    %89 = arith.mulf %87, %88 : vector<1x64x4xf32>
    %cst_28 = arith.constant 0.00999999977 : f32
    %90 = vector.broadcast %cst_28 : f32 to vector<1x64x4xf32>
    %91 = arith.mulf %90, %89 : vector<1x64x4xf32>
    %92 = arith.maximumf %89, %91 : vector<1x64x4xf32>
    %93 = vector.broadcast %69 : vector<1x1x4xf32> to vector<1x64x4xf32>
    %94 = arith.subf %48, %93 : vector<1x64x4xf32>
    %95 = vector.broadcast %78 : vector<1x1x4xf32> to vector<1x64x4xf32>
    %96 = arith.mulf %94, %95 : vector<1x64x4xf32>
    %cst_29 = arith.constant 0.00999999977 : f32
    %97 = vector.broadcast %cst_29 : f32 to vector<1x64x4xf32>
    %98 = arith.mulf %97, %96 : vector<1x64x4xf32>
    %99 = arith.maximumf %96, %98 : vector<1x64x4xf32>
    %100 = vector.broadcast %69 : vector<1x1x4xf32> to vector<1x64x4xf32>
    %101 = arith.subf %60, %100 : vector<1x64x4xf32>
    %102 = vector.broadcast %78 : vector<1x1x4xf32> to vector<1x64x4xf32>
    %103 = arith.mulf %101, %102 : vector<1x64x4xf32>
    %cst_30 = arith.constant 0.00999999977 : f32
    %104 = vector.broadcast %cst_30 : f32 to vector<1x64x4xf32>
    %105 = arith.mulf %104, %103 : vector<1x64x4xf32>
    %106 = arith.maximumf %103, %105 : vector<1x64x4xf32>
    %107 = tpu.concatenate %85, %92, %99, %106 in 2 : vector<1x64x4xf32>, vector<1x64x4xf32>, vector<1x64x4xf32>, vector<1x64x4xf32> -> vector<1x64x16xf32>
    %c0_31 = arith.constant 0 : index
    %c0_32 = arith.constant 0 : index
    %c0_33 = arith.constant 0 : index
    %108 = vector.load %arg4[%c0_31, %c0_32, %c0_33] : memref<1x64x16xf32, #tpu.memory_space<vmem>>, vector<1x64x16xf32>
    tpu.vector_store %arg4[%c0_31, %c0_32, %c0_33], %107 {strides = array<i32>} : memref<1x64x16xf32, #tpu.memory_space<vmem>>, vector<1x64x16xf32>,
    return
  }
  func.func @transform_0(%arg0: i32, %arg1: i32) -> (i32, i32, i32, i32) {
    %c0_i32 = arith.constant 0 : i32
    %c0_i32_0 = arith.constant 0 : i32
    %c0_i32_1 = arith.constant 0 : i32
    %c0_i32_2 = arith.constant 0 : i32
    return %arg0, %c0_i32, %c0_i32_0, %c0_i32_1 : i32, i32, i32, i32
  }
  func.func @transform_1(%arg0: i32, %arg1: i32) -> (i32, i32, i32) {
    %c0_i32 = arith.constant 0 : i32
    %c0_i32_0 = arith.constant 0 : i32
    %c0_i32_1 = arith.constant 0 : i32
    return %c0_i32, %c0_i32_0, %arg1 : i32, i32, i32
  }
  func.func @transform_2(%arg0: i32, %arg1: i32) -> (i32, i32, i32) {
    %c0_i32 = arith.constant 0 : i32
    %c0_i32_0 = arith.constant 0 : i32
    return %arg0, %c0_i32, %arg1 : i32, i32, i32
  }
}

</mosaic_0001>

<bundles_post_ra>
// kernel: tpu_custom_call.1
= control target key start
LH: loop header
LB: loop body
LE: loop exit
PB: predicated region body
PF: predicated region fallthrough
CT: control target
= control target key end

     0   :  { %s1642_s9 = smov 0   ;;  %s1644_s10 = smov 0   ;;  %s2482_s0 = inlined_call_operand.vmem [shape: bf16[2,10,10,8], index: 0, kind: input, shape index: {}]   ;;  %s2483_s1 = inlined_call_operand.vmem [shape: bf16[4,32,4], index: 1, kind: input, shape index: {}]   ;;  %s2484_s2 = inlined_call_operand.vmem [shape: f32[2,64,16], index: 2, kind: output, shape index: {}]  }
   0x1   :  { %s1646_s11 = smov 0  }
   0x2 LB: > { %s24_s12 = sadd.s32 1, %s1615_s10  ;;  %p1477_p0 = scmp.ge.s32.totalorder %s1619_s11, 1  ;;  %s1619_s11 = sphi %s1646_s11, %s12_s11   ;;  %s1615_s10 = sphi %s1644_s10, %s2499_s10   ;;  %s1611_s9 = sphi %s1642_s9, %s2498_s9  }
   0x3   : > { %p26_p1 = scmp.ge.s32.totalorder %s24_s12, 2  ;;  %p135_p2 = scmp.lt.s32.totalorder %s1619_s11, 3 }
   0x5   : > { %s2501_s12 = smov (%p26_p1, %s24_s12), 0  ;;  %p136_p3 = pnand %p1477_p0, %p135_p2 }
   0x7   : > { %139 = sbr.rel (%p136_p3) target bundleno = 629 (0x275), region = 28 }
   0xc   : > { %p164_p4 = scmp.lt.s32.totalorder %s1611_s9, 1  ;;  %vm347_vm0 = vcmask 1042432   ;;  %vm348_vm1 = vcmask 1046532   ;;  %vm202_vm2 = vsmask.f32 3328  ;;  %s1621_s17 = smov 16  }
   0xd   : > { %vm203_vm3 = vsmask.f32 7440  ;;  %vm1687_vm4 = vmor %vm347_vm0, %vm348_vm1  ;;  %s1622_s18 = smov 8   ;;  %s1623_s19 = smov 24   ;;  %vm466_vm6 = vcmask 64512   ;;  %vm479_vm7 = vcmask 130048  }
   0xe   : > { %s2503_s9 = smov (!%p164_p4, %s1611_s9), 1  ;;  %vm1710_vm5 = vmor %vm202_vm2, %vm203_vm3  ;;  %vm488_vm8 = vcmask 195584   ;;  %vm513_vm9 = vcmask 261120   ;;  %vm551_vm10 = vcmask 31744   ;;  %s1625_s8 = smov 4   ;;  %vm1362_vm15 = vcmask 97280  }
   0xf   : > { %s1562_s13 = smul.u32 80, %s2503_s9  ;;  %s1553_s14 = sshll.u32 %s2503_s9, 6 }
  0x11   : > { %s1666_s16 = scalar_lea.vmem %s2482_s0, %s1562_s13  ;;  %s1626_s13 = smov 12  }
  0x12   : > { %v186_v0 = vld [vmem:[%s1666_s16 + $0x10] sm:$0xf]  ;;  %v1670_v1 = vld [vmem:[%s1666_s16 + $0x18] sm:$0xf]  ;;  %v184_v2 = vld [vmem:[%s1666_s16 + $0x8] sm:$0xf] }
  0x13   : > { %v248_v3 = vshrl.u32 %v1670_v1, 16  ;;  %v251_v4 = vshll.u32 %v1670_v1, 16  ;;  %v410_v5 = vunpack.c.l.b16 %v186_v0  ;;  %v411_v6 = vunpack.c.l.b16 %v1670_v1  ;;  %v185_v7 = vld [vmem:[%s1666_s16 + $0xc] sm:$0x1]  ;;  %v187_v8 = vld [vmem:[%s1666_s16 + $0x14] sm:$0x1] }
  0x14   : > { %v234_v9 = vshrl.u32 %v186_v0, 16  ;;  %v237_v10 = vshll.u32 %v186_v0, 16  ;;  %v229_v11 = vshll.u32 %v185_v7, 16  ;;  %v243_v12 = vshll.u32 %v187_v8, 16  ;;  %v182_v17 = vld [vmem:[%s1666_s16] sm:$0xf] }
  0x15   : > { %v250_v13 = vrot.slane %v248_v3, 4  ;;  %v253_v14 = vrot.slane %v251_v4, 5  ;;  %v1680_v15 = vpack.c.b16 %v411_v6, %v410_v5  ;;  %v1482_v16 = vrot.slane %v184_v2, 9  ;;  %v183_v23 = vld [vmem:[%s1666_s16 + $0x4] sm:$0x1] }
  0x16   : > { %v236_v18 = vrot.slane %v234_v9, 4  ;;  %v239_v19 = vrot.slane %v237_v10, 5  ;;  %v1683_v20 = vrot.slane %v229_v11, 5  ;;  %v245_v21 = vrot.slane %v243_v12, 5  ;;  %v189_v32 = vld [vmem:[%s1666_s16 + $0x1c] sm:$0x1] }
  0x17   : > { %v254_v24 = vor.u32 %v253_v14, %v250_v13  ;;  %787 = vrot.lane.b32.xlu0 %v1680_v15, %s1621_s17  ;;  %v356_v25 = vrot.slane %v185_v7, 5  ;;  %v1483_v26 = vrot.slane %v186_v0, 9  ;;  %v360_v27 = vrot.slane %v187_v8, 5  ;;  %v1726_v62 = vld [vmem:[%s1666_s16 + $0x20] sm:$0xf] }
  0x18   : > { %v240_v28 = vor.u32 %v239_v19, %v236_v18  ;;  %v220_v29 = vshrl.u32 %v184_v2, 16  ;;  %v223_v30 = vshll.u32 %v184_v2, 16  ;;  %v1481_v31 = vrot.slane %v182_v17, 9  ;;  %v191_v10 = vld [vmem:[%s1666_s16 + $0x24] sm:$0x1] }
  0x19   : > { %v357_v33 = vsel %vm1687_vm4, %v1482_v16, %v356_v25  ;;  %v361_v34 = vsel %vm1687_vm4, %v1483_v26, %v360_v27  ;;  %v352_v35 = vrot.slane %v183_v23, 5  ;;  %v409_v36 = vunpack.c.l.b16 %v184_v2  ;;  %v1732_v2 = vld [vmem:[%s1666_s16 + $0x28] sm:$0xf] }
  0x1a   : > { %v603_v37 = vunpack.c.l.b16 %v357_v33  ;;  %v604_v38 = vunpack.c.l.b16 %v361_v34  ;;  %v408_v39 = vunpack.c.l.b16 %v182_v17  ;;  %v257_v40 = vshll.u32 %v189_v32, 16  ;;  %v193_v33 = vld [vmem:[%s1666_s16 + $0x2c] sm:$0x1] }
  0x1b   : > { %v353_v41 = vsel %vm1687_vm4, %v1481_v31, %v352_v35  ;;  %v1701_v42 = vpack.c.b16 %v410_v5, %v409_v36  ;;  %v1484_v43 = vrot.slane %v1670_v1, 9  ;;  %v364_v44 = vrot.slane %v189_v32, 5 }
  0x1c   : > { %v1704_v45 = vpack.c.b16 %v604_v38, %v603_v37  ;;  %v602_v46 = vunpack.c.l.b16 %v353_v41  ;;  %v1706_v47 = vpack.c.b16 %v409_v36, %v408_v39  ;;  %v259_v48 = vrot.slane %v257_v40, 5 }
  0x1d   : > { %445 = vrot.lane.b32.xlu2 %v1701_v42, %s1621_s17  ;;  %v1718_v50 = vsel %vm1687_vm4, %v1484_v43, %v364_v44  ;;  %v222_v51 = vrot.slane %v220_v29, 4  ;;  %v225_v52 = vrot.slane %v223_v30, 5  ;;  %v241_v53 = vrot.slane %v240_v28, 4 }
  0x1e   : > { %939 = vrot.lane.b32.xlu1 %v1704_v45, %s1622_s18  ;;  %v610_v54 = vpack.c.b16 %v603_v37, %v602_v46  ;;  %v605_v55 = vunpack.c.l.b16 %v1718_v50  ;;  %v255_v56 = vrot.slane %v254_v24, 4  ;;  %v206_v57 = vshrl.u32 %v182_v17, 16  ;;  %v195_v50 = vld [vmem:[%s1666_s16 + $0x34] sm:$0x1] }
  0x1f   : > { %v226_v58 = vor.u32 %v225_v52, %v222_v51  ;;  %v246_v59 = vsel %vm1710_vm5, %v241_v53, %v245_v21  ;;  %v209_v60 = vshll.u32 %v182_v17, 16  ;;  %v215_v61 = vshll.u32 %v183_v23, 16 }
  0x20   : > { %614 = vrot.lane.b32.xlu0 %v610_v54, %s1622_s18  ;;  %v260_v63 = vsel %vm1710_vm5, %v255_v56, %v259_v48  ;;  %v208_v0 = vrot.slane %v206_v57, 4  ;;  %v422_v4 = vunpack.c.l.b16 %v246_v59  ;;  %v1736_v8 = vpack.c.b16 %v605_v55, %v604_v38  ;;  %v1789_v57 = vld [vmem:[%s1666_s16 + $0x30] sm:$0xf] }
  0x21   : > { %v227_v3 = vrot.slane %v226_v58, 4  ;;  %v423_v5 = vunpack.c.l.b16 %v260_v63  ;;  %v211_v7 = vrot.slane %v209_v60, 5  ;;  %v217_v9 = vrot.slane %v215_v61, 5 }
  0x22   : > { %v262_v11 = vshrl.u32 %v1726_v62, 16  ;;  %v265_v12 = vshll.u32 %v1726_v62, 16  ;;  %v276_v17 = vshrl.u32 %v1732_v2, 16  ;;  %v279_v23 = vshll.u32 %v1732_v2, 16 }
  0x23   : > { %v232_v13 = vsel %vm1710_vm5, %v227_v3, %v1683_v20  ;;  %v1744_v14 = vpack.c.b16 %v423_v5, %v422_v4  ;;  %v212_v16 = vor.u32 %v211_v7, %v208_v0  ;;  %v271_v25 = vshll.u32 %v191_v10, 16  ;;  %v1804_v3 = vld [vmem:[%s1666_s16 + $0x38] sm:$0xf] }
  0x24   : > { %v421_v18 = vunpack.c.l.b16 %v232_v13  ;;  %v264_v19 = vrot.slane %v262_v11, 4  ;;  %v267_v21 = vrot.slane %v265_v12, 5  ;;  %v278_v29 = vrot.slane %v276_v17, 4 }
  0x25   : > { %947 = vrot.lane.b32.xlu2 %v1744_v14, %s1621_s17  ;;  %v213_v24 = vrot.slane %v212_v16, 4  ;;  %v281_v30 = vrot.slane %v279_v23, 5  ;;  %v273_v32 = vrot.slane %v271_v25, 5  ;;  %v285_v36 = vshll.u32 %v193_v33, 16 }
  0x26   : > { %957 = vrot.lane.b32.xlu1 %v1736_v8, %s1623_s19  ;;  %v1752_v20 = vpack.c.b16 %v422_v4, %v421_v18  ;;  %v268_v26 = vor.u32 %v267_v21, %v264_v19  ;;  %v1485_v41 = vrot.slane %v1726_v62, 9  ;;  %v368_v43 = vrot.slane %v191_v10, 5 }
  0x27   : > { %v218_v27 = vsel %vm1710_vm5, %v213_v24, %v217_v9  ;;  %v282_v35 = vor.u32 %v281_v30, %v278_v29  ;;  %v287_v40 = vrot.slane %v285_v36, 5  ;;  %v412_v51 = vunpack.c.l.b16 %v1726_v62  ;;  %v1848_v36 = vld [vmem:[%s1666_s16 + $0x40] sm:$0xf] }
  0x28   : > { %777 = vrot.lane.b32.xlu0 %v1752_v20, %s1622_s18  ;;  %v420_v28 = vunpack.c.l.b16 %v218_v27  ;;  %v269_v31 = vrot.slane %v268_v26, 4  ;;  %v369_v48 = vsel %vm1687_vm4, %v1485_v41, %v368_v43  ;;  %v413_v52 = vunpack.c.l.b16 %v1732_v2 }
  0x29   : > { %v283_v39 = vrot.slane %v282_v35, 4  ;;  %v606_v54 = vunpack.c.l.b16 %v369_v48  ;;  %v290_v59 = vshrl.u32 %v1789_v57, 16  ;;  %v293_v60 = vshll.u32 %v1789_v57, 16 }
  0x2a   : > { %v1759_v34 = vpack.c.b16 %v421_v18, %v420_v28  ;;  %v274_v37 = vsel %vm1710_vm5, %v269_v31, %v273_v32  ;;  %v1786_v56 = vpack.c.b16 %v413_v52, %v412_v51  ;;  %v1486_v61 = vrot.slane %v1732_v2, 9  ;;  %v197_v18 = vld [vmem:[%s1666_s16 + $0x3c] sm:$0x1] }
  0x2b   : > { %v424_v38 = vunpack.c.l.b16 %v274_v37  ;;  %v288_v46 = vsel %vm1710_vm5, %v283_v39, %v287_v40  ;;  %v632_v58 = vpack.c.b16 %v606_v54, %v605_v55  ;;  %v372_v62 = vrot.slane %v193_v33, 5 }
  0x2c   : > { %v425_v53 = vunpack.c.l.b16 %v288_v46  ;;  %v292_v63 = vrot.slane %v290_v59, 4  ;;  %v295_v0 = vrot.slane %v293_v60, 5  ;;  %v304_v4 = vshrl.u32 %v1804_v3, 16 }
  0x2d   : > { %432 = vrot.lane.b32.xlu2 %v1759_v34, %s1622_s18  ;;  %v1770_v44 = vpack.c.b16 %v424_v38, %v423_v5  ;;  %v373_v55 = vsel %vm1687_vm4, %v1486_v61, %v372_v62  ;;  %v307_v5 = vshll.u32 %v1804_v3, 16  ;;  %v299_v9 = vshll.u32 %v195_v50, 16 }
  0x2e   : > { %797 = vrot.lane.b32.xlu1 %v1744_v14, %s1623_s19  ;;  %v296_v7 = vor.u32 %v295_v0, %v292_v63  ;;  %v607_v10 = vunpack.c.l.b16 %v373_v55  ;;  %v306_v11 = vrot.slane %v304_v4, 4  ;;  %v1819_v17 = vpack.c.b16 %v412_v51, %v411_v6  ;;  %v1861_v51 = vld [vmem:[%s1666_s16 + $0x48] sm:$0xf]  ;;  %v201_v4 = vld [vmem:[%s1666_s16 + $0x4c] sm:$0x1] }
  0x2f   : > { %v309_v12 = vrot.slane %v307_v5, 5  ;;  %v301_v16 = vrot.slane %v299_v9, 5  ;;  %v313_v23 = vshll.u32 %v197_v18, 16  ;;  %v1487_v25 = vrot.slane %v1789_v57, 9 }
  0x30   : > { %622 = vrot.lane.b32.xlu0 %v1752_v20, %s1621_s17  ;;  %v297_v13 = vrot.slane %v296_v7, 4  ;;  %v612_v19 = vpack.c.b16 %v607_v10, %v606_v54  ;;  %v376_v26 = vrot.slane %v195_v50, 5  ;;  %v414_v30 = vunpack.c.l.b16 %v1789_v57 }
  0x31   : > { %v310_v21 = vor.u32 %v309_v12, %v306_v11  ;;  %v315_v6 = vrot.slane %v313_v23, 5  ;;  %v415_v31 = vunpack.c.l.b16 %v1804_v3  ;;  %v318_v39 = vshrl.u32 %v1848_v36, 16  ;;  %v1560_v23 = vld [vmem:[%s2483_s1 + $0x30] sm:$0xff] }
  0x32   : > { %v302_v24 = vsel %vm1710_vm5, %v297_v13, %v301_v16  ;;  %v377_v29 = vsel %vm1687_vm4, %v1487_v25, %v376_v26  ;;  %v321_v40 = vshll.u32 %v1848_v36, 16  ;;  %v1488_v41 = vrot.slane %v1804_v3, 9  ;;  %v1561_v16 = vld [vmem:[%s2483_s1 + $0x38] sm:$0xff]  ;;  %v1559_v25 = vld [vmem:[%s2483_s1 + $0x28] sm:$0xff] }
  0x33   : > { %v311_v1 = vrot.slane %v310_v21, 4  ;;  %v608_v33 = vunpack.c.l.b16 %v377_v29  ;;  %v1845_v35 = vpack.c.b16 %v415_v31, %v414_v30  ;;  %v380_v43 = vrot.slane %v197_v18, 5  ;;  %1024 = vmatpush.bf16.msra.mxu3 %v1561_v16  ;;  %864 = vmatpush.bf16.msra.mxu2 %v1559_v25  ;;  %v1558_v29 = vld [vmem:[%s2483_s1 + $0x20] sm:$0xff] }
  0x34   : > { %v320_v46 = vrot.slane %v318_v39, 4  ;;  %v323_v48 = vrot.slane %v321_v40, 5  ;;  %v389_v57 = vshrl.u32 %v1861_v51, 16  ;;  %v1875_v55 = vpack.c.b16 %v414_v30, %v413_v52  ;;  %v1555_v39 = vld [vmem:[%s2483_s1 + $0x8] sm:$0xff]  ;;  %v1556_v40 = vld [vmem:[%s2483_s1 + $0x10] sm:$0xff] }
  0x35   : > { %635 = vrot.lane.b32.xlu2 %v1704_v45, %s1623_s19  ;;  %v1791_v45 = vpack.c.b16 %v425_v53, %v424_v38  ;;  %v316_v28 = vsel %vm1710_vm5, %v311_v1, %v315_v6  ;;  %v633_v38 = vpack.c.b16 %v608_v33, %v607_v10  ;;  %v381_v54 = vsel %vm1687_vm4, %v1488_v41, %v380_v43  ;;  %v1554_v43 = vld [vmem:[%s2483_s1] sm:$0xff] }
  0x36   : > { %458 = vrot.lane.b32.xlu1 %v1752_v20, %s1623_s19  ;;  %v427_v32 = vunpack.c.l.b16 %v316_v28  ;;  %v324_v59 = vor.u32 %v323_v48, %v320_v46  ;;  %v609_v61 = vunpack.c.l.b16 %v381_v54  ;;  %v391_v62 = vrot.slane %v389_v57, 4  ;;  %528 = vmatpush.bf16.msra.mxu0 %v1555_v39 }
  0x37   : > { %v398_v9 = vshll.u32 %v201_v4, 16  ;;  %v1489_v52 = vrot.slane %v1848_v36, 9  ;;  %1025 = vmatpush.bf16.msra.mxu3 %v1560_v23  ;;  %865 = vmatpush.bf16.msra.mxu2 %v1558_v29 }
  0x38   : > { %779 = vrot.lane.b32.xlu0 %v1770_v44, %s1622_s18  ;;  %v325_v0 = vrot.slane %v324_v59, 4  ;;  %v613_v5 = vpack.c.b16 %v609_v61, %v608_v33  ;;  %v1490_v33 = vrot.slane %v1861_v51, 9 }
  0x39   : > { %v400_v2 = vrot.slane %v398_v9, 5 }
  0x3a   : > { %529 = vmatpush.bf16.msra.mxu0 %v1554_v43 }
  0x3d   : > { %799 = vrot.lane.b32.xlu2 %v1791_v45, %s1623_s19 }
  0x3e   : > { %789 = vrot.lane.b32.xlu1 %v1786_v56, %s1621_s17 }
  0x40   : > { %941 = vrot.lane.b32.xlu0 %v632_v58, %s1622_s18 }
  0x45   : > { %434 = vrot.lane.b32.xlu2 %v1744_v14, %s1622_s18 }
  0x46   : > { %949 = vrot.lane.b32.xlu1 %v1791_v45, %s1621_s17 }
  0x48   : > { %616 = vrot.lane.b32.xlu0 %v1736_v8, %s1622_s18  ;;  %v426_v8 = vunpack.c.l.b16 %v302_v24  ;;  %v440_v24 = vunpack.c.l.b16 %v1848_v36  ;;  %v406_v36 = vrot.slane %v201_v4, 5 }
  0x4a   : > { %v1830_v27 = vpack.c.b16 %v426_v8, %v425_v53  ;;  %v1850_v37 = vpack.c.b16 %v427_v32, %v426_v8  ;;  %v199_v53 = vld [vmem:[%s1666_s16 + $0x44] sm:$0x1]  ;;  %v785_v8 = vunpack.c.l.b16 %v1861_v51  ;;  %v407_v41 = vsel %vm1687_vm4, %v1490_v33, %v406_v36 }
  0x4b   : > { %v327_v60 = vshll.u32 %v199_v53, 16  ;;  %v386_v13 = vrot.slane %v199_v53, 5  ;;  %v955_v46 = vunpack.c.l.b16 %v407_v41  ;;  %v1937_v22 = vpack.c.b16 %v440_v24, %v415_v31 }
  0x4c   : > { %v786_v26 = vpack.c.b16 %v785_v8, %v440_v24 }
  0x4d   : > { %447 = vrot.lane.b32.xlu2 %v1819_v17, %s1621_s17  ;;  %v329_v50 = vrot.slane %v327_v60, 5  ;;  %v387_v21 = vsel %vm1687_vm4, %v1489_v52, %v386_v13 }
  0x4e   : > { %959 = vrot.lane.b32.xlu1 %v612_v19, %s1623_s19  ;;  %v630_v6 = vunpack.c.l.b16 %v387_v21 }
  0x4f   : > { %v330_v10 = vsel %vm1710_vm5, %v325_v0, %v329_v50 }
  0x50   : > { %624 = vrot.lane.b32.xlu0 %v1770_v44, %s1621_s17  ;;  %v453_v11 = vunpack.c.l.b16 %v330_v10  ;;  %v634_v30 = vpack.c.b16 %v630_v6, %v609_v61  ;;  %v956_v53 = vpack.c.b16 %v955_v46, %v630_v6 }
  0x52   : > { %v1889_v18 = vpack.c.b16 %v453_v11, %v427_v32 }
  0x55   : > { %637 = vrot.lane.b32.xlu2 %v632_v58, %s1623_s19  ;;  %v392_v58 = vshll.u32 %v1861_v51, 16 }
  0x56   : > { %460 = vrot.lane.b32.xlu1 %v1770_v44, %s1623_s19 }
  0x57   : > { %v394_v63 = vrot.slane %v392_v58, 5 }
  0x58   : > { %781 = vrot.lane.b32.xlu0 %v1830_v27, %s1622_s18 }
  0x59   : > { %v395_v7 = vor.u32 %v394_v63, %v391_v62 }
  0x5b   : > { %v396_v12 = vrot.slane %v395_v7, 4 }
  0x5d   : > { %801 = vrot.lane.b32.xlu2 %v1850_v37, %s1623_s19 }
  0x5e   : > { %791 = vrot.lane.b32.xlu1 %v1845_v35, %s1621_s17 }
  0x60   : > { %943 = vrot.lane.b32.xlu0 %v633_v38, %s1622_s18 }
  0x65   : > { %436 = vrot.lane.b32.xlu2 %v1791_v45, %s1622_s18 }
  0x66   : > { %951 = vrot.lane.b32.xlu1 %v1850_v37, %s1621_s17 }
  0x68   : > { %618 = vrot.lane.b32.xlu0 %v612_v19, %s1622_s18  ;;  %v401_v19 = vsel %vm1710_vm5, %v396_v12, %v400_v2 }
  0x69   : > { %v795_v49 = vunpack.c.l.b16 %v401_v19 }
  0x6b   : > { %v796_v28 = vpack.c.b16 %v795_v49, %v453_v11 }
  0x6d   : > { %449 = vrot.lane.b32.xlu2 %v1875_v55, %s1621_s17 }
  0x6e   : > { %961 = vrot.lane.b32.xlu1 %v613_v5, %s1623_s19 }
  0x70   : > { %626 = vrot.lane.b32.xlu0 %v1830_v27, %s1621_s17 }
  0x75   : > { %639 = vrot.lane.b32.xlu2 %v633_v38, %s1623_s19  ;;  %v1557_v38 = vld [vmem:[%s2483_s1 + $0x18] sm:$0xff] }
  0x76   : > { %462 = vrot.lane.b32.xlu1 %v1830_v27, %s1623_s19  ;;  %702 = vmatpush.bf16.msra.mxu1 %v1557_v38 }
  0x77   : > { %v1903_v1 = vpop.permute.xlu2 %445 }
  0x78   : > { %783 = vrot.lane.b32.xlu0 %v1889_v18, %s1622_s18 }
  0x7a   : > { %703 = vmatpush.bf16.msra.mxu1 %v1556_v40 }
  0x7d   : > { %803 = vrot.lane.b32.xlu2 %v796_v28, %s1623_s19 }
  0x7e   : > { %793 = vrot.lane.b32.xlu1 %v786_v26, %s1621_s17 }
  0x7f   : > { %v948_v32 = vpop.permute.xlu2 %947 }
  0x80   : > { %945 = vrot.lane.b32.xlu0 %v634_v30, %s1622_s18 }
  0x85   : > { %438 = vrot.lane.b32.xlu2 %v1850_v37, %s1622_s18 }
  0x86   : > { %953 = vrot.lane.b32.xlu1 %v796_v28, %s1621_s17 }
  0x87   : > { %v433_v48 = vpop.permute.xlu2 %432 }
  0x88   : > { %620 = vrot.lane.b32.xlu0 %v613_v5, %s1622_s18  ;;  %v469_v11 = vsel %vm466_vm6, %v1706_v47, %v433_v48 }
  0x89   : > { %v788_v51 = vpop.permute.xlu0 %787  ;;  %v481_v12 = vsel %vm479_vm7, %v469_v11, %v1903_v1 }
  0x8d   : > { %451 = vrot.lane.b32.xlu2 %v1937_v22, %s1621_s17 }
  0x8e   : > { %963 = vrot.lane.b32.xlu1 %v956_v53, %s1623_s19 }
  0x8f   : > { %v636_v54 = vpop.permute.xlu2 %635 }
  0x90   : > { %v940_v57 = vpop.permute.xlu1 %939  ;;  %628 = vrot.lane.b32.xlu0 %v1889_v18, %s1621_s17  ;;  %s2417_s17 = scalar_lea.vmem %s2484_s2, %s1553_s14 }
  0x91   : > { %v967_v59 = vsel %vm466_vm6, %v1752_v20, %v940_v57 }
  0x92   : > { %v615_v58 = vpop.permute.xlu0 %614  ;;  %v978_v60 = vsel %vm479_vm7, %v967_v59, %v948_v32 }
  0x93   : > { %v645_v5 = vsel %vm466_vm6, %v1759_v34, %v615_v58 }
  0x95   : > { %641 = vrot.lane.b32.xlu2 %v634_v30, %s1623_s19 }
  0x96   : > { %464 = vrot.lane.b32.xlu1 %v1889_v18, %s1623_s19 }
  0x97   : > { %v800_v3 = vpop.permute.xlu2 %799 }
  0x98   : > { %v958_v31 = vpop.permute.xlu1 %957 }
  0x99   : > { %v986_v61 = vsel %vm488_vm8, %v978_v60, %v958_v31 }
  0x9a   : > { %1547 = vmatmul.msk.bf16.vlgmr.msra.gmra.mxu3 %vm513_vm9, %v986_v61  ;;  %v778_v62 = vpop.permute.xlu0 %777 }
  0x9b   : > { %v807_v20 = vsel %vm466_vm6, %v1701_v42, %v778_v62 }
  0x9c   : > { %v818_v63 = vsel %vm479_vm7, %v807_v20, %v788_v51 }
  0x9f   : > { %v435_v0 = vpop.permute.xlu2 %434 }
  0xa0   : > { %v798_v50 = vpop.permute.xlu1 %797  ;;  %v472_v32 = vsel %vm466_vm6, %v1680_v15, %v435_v0 }
  0xa1   : > { %v826_v4 = vsel %vm488_vm8, %v818_v63, %v798_v50 }
  0xa2   : > { %1531 = vmatmul.msk.bf16.vlgmr.msra.gmra.mxu2 %vm513_vm9, %v826_v4  ;;  %v623_v7 = vpop.permute.xlu0 %622 }
  0xa3   : > { %v656_v9 = vsel %vm479_vm7, %v645_v5, %v623_v7 }
  0xa4   : > { %v664_v10 = vsel %vm488_vm8, %v656_v9, %v636_v54 }
  0xa5   : > { %1515 = vmatmul.msk.bf16.vlgmr.msra.gmra.mxu1 %vm513_vm9, %v664_v10 }
  0xa7   : > { %v448_v52 = vpop.permute.xlu2 %447 }
  0xa8   : > { %v459_v42 = vpop.permute.xlu1 %458  ;;  %v483_v33 = vsel %vm479_vm7, %v472_v32, %v448_v52 }
  0xa9   : > { %v490_v2 = vsel %vm488_vm8, %v481_v12, %v459_v42 }
  0xaa   : > { %1499 = vmatmul.msk.bf16.vlgmr.msra.gmra.mxu0 %vm513_vm9, %v490_v2  ;;  %v780_v34 = vpop.permute.xlu0 %779 }
  0xab   : > { %v810_v13 = vsel %vm466_vm6, %v1819_v17, %v780_v34 }
  0xaf   : > { %v638_v23 = vpop.permute.xlu2 %637 }
  0xb0   : > { %v790_v16 = vpop.permute.xlu1 %789 }
  0xb1   : > { %v820_v19 = vsel %vm479_vm7, %v810_v13, %v790_v16 }
  0xb2   : > { %v828_v47 = vsel %vm488_vm8, %v820_v19, %v800_v3  ;;  %v942_v21 = vpop.permute.xlu0 %941 }
  0xb3   : > { %1532 = vmatmul.msk.bf16.gmra.mxu2 %vm513_vm9, %v828_v47  ;;  %v970_v1 = vsel %vm466_vm6, %v1770_v44, %v942_v21 }
  0xb7   : > { %v802_v49 = vpop.permute.xlu2 %801 }
  0xb8   : > { %v950_v24 = vpop.permute.xlu1 %949 }
  0xb9   : > { %v980_v6 = vsel %vm479_vm7, %v970_v1, %v950_v24 }
  0xba   : > { %v617_v8 = vpop.permute.xlu0 %616 }
  0xbb   : > { %v648_v26 = vsel %vm466_vm6, %v1744_v14, %v617_v8 }
  0xbf   : > { %v437_v44 = vpop.permute.xlu2 %436 }
  0xc0   : > { %v960_v25 = vpop.permute.xlu1 %959  ;;  %v475_v61 = vsel %vm466_vm6, %v1786_v56, %v437_v44 }
  0xc1   : > { %v988_v17 = vsel %vm488_vm8, %v980_v6, %v960_v25 }
  0xc2   : > { %1548 = vmatmul.msk.bf16.gmra.mxu3 %vm513_vm9, %v988_v17  ;;  %v625_v28 = vpop.permute.xlu0 %624 }
  0xc3   : > { %v658_v29 = vsel %vm479_vm7, %v648_v26, %v625_v28 }
  0xc4   : > { %v666_v30 = vsel %vm488_vm8, %v658_v29, %v638_v23 }
  0xc5   : > { %1516 = vmatmul.msk.bf16.gmra.mxu1 %vm513_vm9, %v666_v30 }
  0xc7   : > { %v450_v43 = vpop.permute.xlu2 %449 }
  0xc8   : > { %v461_v36 = vpop.permute.xlu1 %460  ;;  %v485_v62 = vsel %vm479_vm7, %v475_v61, %v450_v43 }
  0xc9   : > { %v492_v38 = vsel %vm488_vm8, %v483_v33, %v461_v36 }
  0xca   : > { %1500 = vmatmul.msk.bf16.gmra.mxu0 %vm513_vm9, %v492_v38  ;;  %v782_v14 = vpop.permute.xlu0 %781 }
  0xcb   : > { %v813_v39 = vsel %vm466_vm6, %v1875_v55, %v782_v14 }
  0xcf   : > { %v640_v53 = vpop.permute.xlu2 %639 }
  0xd0   : > { %v792_v40 = vpop.permute.xlu1 %791 }
  0xd1   : > { %v822_v41 = vsel %vm479_vm7, %v813_v39, %v792_v40 }
  0xd2   : > { %v830_v15 = vsel %vm488_vm8, %v822_v41, %v802_v49  ;;  %v944_v46 = vpop.permute.xlu0 %943 }
  0xd3   : > { %1533 = vmatmul.msk.bf16.gmra.mxu2 %vm513_vm9, %v830_v15  ;;  %v973_v54 = vsel %vm466_vm6, %v1830_v27, %v944_v46 }
  0xd7   : > { %v804_v27 = vpop.permute.xlu2 %803 }
  0xd8   : > { %v952_v48 = vpop.permute.xlu1 %951 }
  0xd9   : > { %v982_v57 = vsel %vm479_vm7, %v973_v54, %v952_v48 }
  0xda   : > { %v619_v51 = vpop.permute.xlu0 %618 }
  0xdb   : > { %v651_v59 = vsel %vm466_vm6, %v1791_v45, %v619_v51 }
  0xdf   : > { %v439_v50 = vpop.permute.xlu2 %438 }
  0xe0   : > { %v962_v58 = vpop.permute.xlu1 %961  ;;  %v478_v47 = vsel %vm466_vm6, %v1845_v35, %v439_v50 }
  0xe1   : > { %v990_v55 = vsel %vm488_vm8, %v982_v57, %v962_v58 }
  0xe2   : > { %1549 = vmatmul.msk.bf16.gmra.mxu3 %vm513_vm9, %v990_v55  ;;  %v627_v3 = vpop.permute.xlu0 %626 }
  0xe3   : > { %v660_v31 = vsel %vm479_vm7, %v651_v59, %v627_v3 }
  0xe4   : > { %v668_v60 = vsel %vm488_vm8, %v660_v31, %v640_v53 }
  0xe5   : > { %1517 = vmatmul.msk.bf16.gmra.mxu1 %vm513_vm9, %v668_v60 }
  0xe7   : > { %v452_v10 = vpop.permute.xlu2 %451 }
  0xe8   : > { %v463_v20 = vpop.permute.xlu1 %462 }
  0xe9   : > { %v494_v63 = vsel %vm488_vm8, %v485_v62, %v463_v20 }
  0xea   : > { %1501 = vmatmul.msk.bf16.gmra.mxu0 %vm513_vm9, %v494_v63  ;;  %v784_v45 = vpop.permute.xlu0 %783 }
  0xeb   : > { %v816_v0 = vsel %vm466_vm6, %v1937_v22, %v784_v45 }
  0xef   : > { %v642_v52 = vpop.permute.xlu2 %641 }
  0xf0   : > { %v794_v4 = vpop.permute.xlu1 %793 }
  0xf1   : > { %v824_v5 = vsel %vm479_vm7, %v816_v0, %v794_v4 }
  0xf2   : > { %v832_v56 = vsel %vm488_vm8, %v824_v5, %v804_v27  ;;  %v946_v7 = vpop.permute.xlu0 %945 }
  0xf3   : > { %1534 = vmatmul.msk.bf16.gmra.mxu2 %vm513_vm9, %v832_v56  ;;  %v976_v42 = vsel %vm466_vm6, %v1889_v18, %v946_v7  ;;  %v487_v18 = vsel %vm479_vm7, %v478_v47, %v452_v10 }
  0xf8   : > { %v954_v9 = vpop.permute.xlu1 %953 }
  0xf9   : > { %v984_v12 = vsel %vm479_vm7, %v976_v42, %v954_v9 }
  0xfa   : > { %v621_v11 = vpop.permute.xlu0 %620 }
  0xfb   : > { %v654_v34 = vsel %vm466_vm6, %v1850_v37, %v621_v11 }
 0x100   : > { %v964_v2 = vpop.permute.xlu1 %963 }
 0x101   : > { %v992_v22 = vsel %vm488_vm8, %v984_v12, %v964_v2 }
 0x102   : > { %1550 = vmatmul.msk.bf16.gmra.mxu3 %vm513_vm9, %v992_v22  ;;  %v629_v13 = vpop.permute.xlu0 %628 }
 0x103   : > { %v662_v16 = vsel %vm479_vm7, %v654_v34, %v629_v13 }
 0x104   : > { %v670_v19 = vsel %vm488_vm8, %v662_v16, %v642_v52 }
 0x105   : > { %1518 = vmatmul.msk.bf16.gmra.mxu1 %vm513_vm9, %v670_v19 }
 0x108   : > { %v465_v21 = vpop.permute.xlu1 %464 }
 0x109   : > { %v496_v23 = vsel %vm488_vm8, %v487_v18, %v465_v21 }
 0x10a   : > { %1502 = vmatmul.msk.bf16.gmra.mxu0 %vm513_vm9, %v496_v23 }
 0x11d   : > { %v2034_v1 = vpop.f32.mrf.mxu3 }
 0x11e   : > { %v1068_v44 = vmul.f32 %v2034_v1, %v2034_v1  ;;  %v1047_v41 = vsel %vm551_vm10, %v2034_v1, 0.0 }
 0x120   : > { %v1076_v43 = vsel %vm551_vm10, %v1068_v44, 0.0 }
 0x122   : > { %v2032_v8 = vpop.f32.mrf.mxu1 }
 0x123   : > { %v746_v33 = vmul.f32 %v2032_v8, %v2032_v8  ;;  %v725_v48 = vsel %vm551_vm10, %v2032_v8, 0.0 }
 0x125   : > { %v2028_v37 = vpop.f32.mrf.mxu2  ;;  %v2042_v25 = vpop.f32.mrf.mxu3  ;;  %v754_v51 = vsel %vm551_vm10, %v746_v33, 0.0 }
 0x126   : > { %v1048_v38 = vsel %vm551_vm10, %v2042_v25, 0.0  ;;  %v908_v39 = vmul.f32 %v2028_v37, %v2028_v37  ;;  %v1069_v40 = vmul.f32 %v2042_v25, %v2042_v25  ;;  %v887_v53 = vsel %vm551_vm10, %v2028_v37, 0.0 }
 0x127   : > { %v2036_v49 = vpop.f32.mrf.mxu0  ;;  %v1049_v54 = vadd.f32 %v1048_v38, %v1047_v41 }
 0x128   : > { %v573_v57 = vmul.f32 %v2036_v49, %v2036_v49  ;;  %v916_v31 = vsel %vm551_vm10, %v908_v39, 0.0  ;;  %v1077_v60 = vsel %vm551_vm10, %v1069_v40, 0.0  ;;  %v552_v50 = vsel %vm551_vm10, %v2036_v49, 0.0 }
 0x129   : > { %v1078_v9 = vadd.f32 %v1077_v60, %v1076_v43 }
 0x12a   : > { %v2040_v6 = vpop.f32.mrf.mxu1  ;;  %v581_v10 = vsel %vm551_vm10, %v573_v57, 0.0 }
 0x12b   : > { %v747_v58 = vmul.f32 %v2040_v6, %v2040_v6  ;;  %v726_v61 = vsel %vm551_vm10, %v2040_v6, 0.0 }
 0x12c   : > { %v727_v11 = vadd.f32 %v726_v61, %v725_v48 }
 0x12d   : > { %v2030_v24 = vpop.f32.mrf.mxu2  ;;  %v755_v42 = vsel %vm551_vm10, %v747_v58, 0.0 }
 0x12e   : > { %v909_v14 = vmul.f32 %v2030_v24, %v2030_v24  ;;  %v888_v55 = vsel %vm551_vm10, %v2030_v24, 0.0  ;;  %v756_v33 = vadd.f32 %v755_v42, %v754_v51 }
 0x12f   : > { %v2044_v17 = vpop.f32.mrf.mxu0  ;;  %v889_v4 = vadd.f32 %v888_v55, %v887_v53 }
 0x130   : > { %v917_v59 = vsel %vm551_vm10, %v909_v14, 0.0  ;;  %v574_v27 = vmul.f32 %v2044_v17, %v2044_v17  ;;  %v553_v12 = vsel %vm551_vm10, %v2044_v17, 0.0 }
 0x131   : > { %v918_v5 = vadd.f32 %v917_v59, %v916_v31  ;;  %v554_v38 = vadd.f32 %v553_v12, %v552_v50 }
 0x132   : > { %v582_v2 = vsel %vm551_vm10, %v574_v27, 0.0 }
 0x133   : > { %v583_v14 = vadd.f32 %v582_v2, %v581_v10 }
 0x136   : > { %v2038_v35 = vpop.f32.mrf.mxu2 }
 0x137   : > { %v910_v15 = vmul.f32 %v2038_v35, %v2038_v35  ;;  %v890_v20 = vsel %vm551_vm10, %v2038_v35, 0.0 }
 0x138   : > { %v891_v22 = vadd.f32 %v890_v20, %v889_v4 }
 0x139   : > { %v919_v63 = vsel %vm551_vm10, %v910_v15, 0.0 }
 0x13a   : > { %v920_v52 = vadd.f32 %v919_v63, %v918_v5 }
 0x13e   : > { %v2046_v26 = vpop.f32.mrf.mxu2 }
 0x13f   : > { %v911_v45 = vmul.f32 %v2046_v26, %v2046_v26  ;;  %v892_v34 = vsel %vm551_vm10, %v2046_v26, 0.0 }
 0x140   : > { %v893_v41 = vadd.f32 %v892_v34, %v891_v22 }
 0x141   : > { %v921_v13 = vsel %vm551_vm10, %v911_v45, 0.0 }
 0x142   : > { %v2048_v28 = vpop.f32.mrf.mxu1  ;;  %v922_v43 = vadd.f32 %v921_v13, %v920_v52 }
 0x143   : > { %v748_v0 = vmul.f32 %v2048_v28, %v2048_v28  ;;  %v728_v16 = vsel %vm551_vm10, %v2048_v28, 0.0 }
 0x144   : > { %v729_v57 = vadd.f32 %v728_v16, %v727_v11 }
 0x145   : > { %v2050_v29 = vpop.f32.mrf.mxu3  ;;  %v757_v19 = vsel %vm551_vm10, %v748_v0, 0.0 }
 0x146   : > { %2492 = vst [vmem:[#allocation2_spill] sm:$0xff] %v2050_v29  ;;  %v1070_v56 = vmul.f32 %v2050_v29, %v2050_v29  ;;  %v1050_v18 = vsel %vm551_vm10, %v2050_v29, 0.0  ;;  %v758_v58 = vadd.f32 %v757_v19, %v756_v33 }
 0x147   : > { %v2052_v30 = vpop.f32.mrf.mxu0  ;;  %v1051_v51 = vadd.f32 %v1050_v18, %v1049_v54 }
 0x148   : > { %v1079_v21 = vsel %vm551_vm10, %v1070_v56, 0.0  ;;  %v575_v23 = vmul.f32 %v2052_v30, %v2052_v30  ;;  %v555_v15 = vsel %vm551_vm10, %v2052_v30, 0.0 }
 0x149   : > { %v1080_v55 = vadd.f32 %v1079_v21, %v1078_v9  ;;  %v556_v27 = vadd.f32 %v555_v15, %v554_v38 }
 0x14a   : > { %v2060_v36 = vpop.f32.mrf.mxu1  ;;  %v584_v59 = vsel %vm551_vm10, %v575_v23, 0.0 }
 0x14b   : > { %v749_v44 = vmul.f32 %v2060_v36, %v2060_v36  ;;  %v730_v31 = vsel %vm551_vm10, %v2060_v36, 0.0  ;;  %v585_v56 = vadd.f32 %v584_v59, %v583_v14 }
 0x14c   : > { %v731_v9 = vadd.f32 %v730_v31, %v729_v57 }
 0x14d   : > { %v2075_v46 = vpop.f32.mrf.mxu3  ;;  %v759_v60 = vsel %vm551_vm10, %v749_v44, 0.0 }
 0x14e   : > { %2493 = vst [vmem:[#allocation3_spill] sm:$0xff] %v2075_v46  ;;  %v1071_v39 = vmul.f32 %v2075_v46, %v2075_v46  ;;  %v1052_v20 = vsel %vm551_vm10, %v2075_v46, 0.0  ;;  %v760_v10 = vadd.f32 %v759_v60, %v758_v58 }
 0x14f   : > { %v2089_v3 = vpop.f32.mrf.mxu0  ;;  %v1053_v42 = vadd.f32 %v1052_v20, %v1051_v51 }
 0x150   : > { %v1081_v63 = vsel %vm551_vm10, %v1071_v39, 0.0  ;;  %v576_v54 = vmul.f32 %v2089_v3, %v2089_v3  ;;  %v557_v12 = vsel %vm551_vm10, %v2089_v3, 0.0 }
 0x151   : > { %v1082_v52 = vadd.f32 %v1081_v63, %v1080_v55 }
 0x152   : > { %v586_v34 = vsel %vm551_vm10, %v576_v54, 0.0 }
 0x153   : > { %v587_v58 = vadd.f32 %v586_v34, %v585_v56 }
 0x156   : > { %v2054_v32 = vpop.f32.mrf.mxu2 }
 0x157   : > { %v912_v48 = vmul.f32 %v2054_v32, %v2054_v32  ;;  %v894_v61 = vsel %vm551_vm10, %v2054_v32, 0.0 }
 0x158   : > { %v895_v11 = vadd.f32 %v894_v61, %v893_v41 }
 0x159   : > { %v923_v45 = vsel %vm551_vm10, %v912_v48, 0.0 }
 0x15a   : > { %v924_v13 = vadd.f32 %v923_v45, %v922_v43  ;;  %v558_v43 = vadd.f32 %v557_v12, %v556_v27  ;;  %v1624_v27 = vmov 256.0  }
 0x15b   : > { %1593 = vrcp.f32 %v1624_v27 }
 0x15e   : > { %v2097_v62 = vpop.f32.mrf.mxu2 }
 0x15f   : > { %v896_v0 = vsel %vm551_vm10, %v2097_v62, 0.0  ;;  %v913_v50 = vmul.f32 %v2097_v62, %v2097_v62 }
 0x160   : > { %v897_v16 = vadd.f32 %v896_v0, %v895_v11 }
 0x161   : > { %v925_v18 = vsel %vm551_vm10, %v913_v50, 0.0 }
 0x162   : > { %v2110_v7 = vpop.f32.mrf.mxu1  ;;  %v926_v51 = vadd.f32 %v925_v18, %v924_v13 }
 0x163   : > { %v750_v4 = vmul.f32 %v2110_v7, %v2110_v7  ;;  %v732_v21 = vsel %vm551_vm10, %v2110_v7, 0.0 }
 0x164   : > { %v733_v55 = vadd.f32 %v732_v21, %v731_v9 }
 0x165   : > { %v2123_v47 = vpop.f32.mrf.mxu3  ;;  %v761_v23 = vsel %vm551_vm10, %v750_v4, 0.0 }
 0x166   : > { %2494 = vst [vmem:[#allocation4_spill] sm:$0xff] %v2123_v47  ;;  %v1072_v44 = vmul.f32 %v2123_v47, %v2123_v47  ;;  %v762_v31 = vadd.f32 %v761_v23, %v760_v10  ;;  %v1054_v63 = vsel %vm551_vm10, %v2123_v47, 0.0 }
 0x167   : > { %v2134_v40 = vpop.f32.mrf.mxu0  ;;  %v1055_v34 = vadd.f32 %v1054_v63, %v1053_v42 }
 0x168   : > { %v577_v15 = vmul.f32 %v2134_v40, %v2134_v40  ;;  %v1083_v54 = vsel %vm551_vm10, %v1072_v44, 0.0  ;;  %v559_v45 = vsel %vm551_vm10, %v2134_v40, 0.0 }
 0x169   : > { %v1084_v13 = vadd.f32 %v1083_v54, %v1082_v52 }
 0x16a   : > { %v2160_v5 = vpop.f32.mrf.mxu1  ;;  %v588_v50 = vsel %vm551_vm10, %v577_v15, 0.0 }
 0x16b   : > { %v751_v48 = vmul.f32 %v2160_v5, %v2160_v5  ;;  %v734_v4 = vsel %vm551_vm10, %v2160_v5, 0.0  ;;  %v589_v21 = vadd.f32 %v588_v50, %v587_v58 }
 0x16c   : > { %v735_v23 = vadd.f32 %v734_v4, %v733_v55 }
 0x16d   : > { %v2169_v19 = vpop.f32.mrf.mxu3  ;;  %v763_v56 = vsel %vm551_vm10, %v751_v48, 0.0 }
 0x16e   : > { %v1073_v60 = vmul.f32 %v2169_v19, %v2169_v19  ;;  %v1056_v10 = vsel %vm551_vm10, %v2169_v19, 0.0  ;;  %v764_v15 = vadd.f32 %v763_v56, %v762_v31 }
 0x16f   : > { %v2179_v38 = vpop.f32.mrf.mxu0  ;;  %v1057_v48 = vadd.f32 %v1056_v10, %v1055_v34 }
 0x170   : > { %v578_v9 = vmul.f32 %v2179_v38, %v2179_v38  ;;  %v1085_v18 = vsel %vm551_vm10, %v1073_v60, 0.0  ;;  %v561_v44 = vsel %vm551_vm10, %v2179_v38, 0.0 }
 0x172   : > { %v590_v42 = vsel %vm551_vm10, %v578_v9, 0.0 }
 0x173   : > { %v591_v63 = vadd.f32 %v590_v42, %v589_v21 }
 0x176   : > { %v2140_v53 = vpop.f32.mrf.mxu2 }
 0x177   : > { %v898_v2 = vsel %vm551_vm10, %v2140_v53, 0.0  ;;  %v914_v22 = vmul.f32 %v2140_v53, %v2140_v53 }
 0x178   : > { %v899_v14 = vadd.f32 %v898_v2, %v897_v16  ;;  %v560_v16 = vadd.f32 %v559_v45, %v558_v43  ;;  %v1086_v43 = vadd.f32 %v1085_v18, %v1084_v13 }
 0x179   : > { %v927_v57 = vsel %vm551_vm10, %v914_v22, 0.0 }
 0x17a   : > { %v928_v0 = vadd.f32 %v927_v57, %v926_v51  ;;  %v562_v55 = vadd.f32 %v561_v44, %v560_v16 }
 0x17e   : > { %v2177_v33 = vpop.f32.mrf.mxu2 }
 0x17f   : > { %v900_v39 = vsel %vm551_vm10, %v2177_v33, 0.0  ;;  %v915_v41 = vmul.f32 %v2177_v33, %v2177_v33 }
 0x180   : > { %v901_v59 = vadd.f32 %v900_v39, %v899_v14 }
 0x181   : > { %v929_v61 = vsel %vm551_vm10, %v915_v41, 0.0  ;;  %v2219_v41 = vpop.eup %1593 }
 0x182   : > { %v2193_v20 = vpop.f32.mrf.mxu1  ;;  %v902_v11 = vrot.slane %v901_v59, 4  ;;  %v930_v12 = vadd.f32 %v929_v61, %v928_v0  ;;  %v1100_v45 = vmul.f32 256.0, %v2219_v41  ;;  %vm1104_vm11 = vweird.f32 %v2219_v41 }
 0x183   : > { %v752_v2 = vmul.f32 %v2193_v20, %v2193_v20  ;;  %v736_v14 = vsel %vm551_vm10, %v2193_v20, 0.0 }
 0x184   : > { %v903_v57 = vadd.f32 %v902_v11, %v901_v59  ;;  %v931_v58 = vrot.slane %v930_v12, 4  ;;  %v737_v60 = vadd.f32 %v736_v14, %v735_v23  ;;  %v1101_v47 = vsub.f32 1.0, %v1100_v45 }
 0x185   : > { %v2210_v22 = vpop.f32.mrf.mxu3  ;;  %v765_v51 = vsel %vm551_vm10, %v752_v2, 0.0 }
 0x186   : > { %v1074_v52 = vmul.f32 %v2210_v22, %v2210_v22  ;;  %v1058_v61 = vsel %vm551_vm10, %v2210_v22, 0.0  ;;  %v766_v0 = vadd.f32 %v765_v51, %v764_v15  ;;  %v904_v9 = vrot.slane %v903_v57, 2 }
 0x187   : > { %v2217_v39 = vpop.f32.mrf.mxu0  ;;  %v932_v10 = vadd.f32 %v931_v58, %v930_v12  ;;  %v1059_v11 = vadd.f32 %v1058_v61, %v1057_v48 }
 0x188   : > { %v579_v27 = vmul.f32 %v2217_v39, %v2217_v39  ;;  %v1087_v50 = vsel %vm551_vm10, %v1074_v52, 0.0  ;;  %v563_v4 = vsel %vm551_vm10, %v2217_v39, 0.0 }
 0x189   : > { %v1088_v23 = vadd.f32 %v1087_v50, %v1086_v43  ;;  %v564_v44 = vadd.f32 %v563_v4, %v562_v55 }
 0x18a   : > { %v2229_v31 = vpop.f32.mrf.mxu1  ;;  %v592_v13 = vsel %vm551_vm10, %v579_v27, 0.0 }
 0x18b   : > { %v738_v54 = vsel %vm551_vm10, %v2229_v31, 0.0  ;;  %v753_v59 = vmul.f32 %v2229_v31, %v2229_v31  ;;  %v593_v51 = vadd.f32 %v592_v13, %v591_v63  ;;  %v905_v63 = vadd.f32 %v904_v9, %v903_v57 }
 0x18c   : > { %v739_v56 = vadd.f32 %v738_v54, %v737_v60 }
 0x18d   : > { %v767_v2 = vsel %vm551_vm10, %v753_v59, 0.0  ;;  %v2240_v34 = vpop.f32.mrf.mxu3 }
 0x18e   : > { %v740_v16 = vrot.slane %v739_v56, 4  ;;  %v768_v18 = vadd.f32 %v767_v2, %v766_v0  ;;  %v1060_v21 = vsel %vm551_vm10, %v2240_v34, 0.0  ;;  %v1075_v15 = vmul.f32 %v2240_v34, %v2240_v34 }
 0x18f   : > { %v1061_v14 = vadd.f32 %v1060_v21, %v1059_v11  ;;  %v2247_v42 = vpop.f32.mrf.mxu0 }
 0x190   : > { %v741_v12 = vadd.f32 %v740_v16, %v739_v56  ;;  %v769_v48 = vrot.slane %v768_v18, 4  ;;  %v565_v52 = vsel %vm551_vm10, %v2247_v42, 0.0  ;;  %v580_v58 = vmul.f32 %v2247_v42, %v2247_v42 }
 0x191   : > { %v1062_v60 = vrot.slane %v1061_v14, 4  ;;  %v1089_v61 = vsel %vm551_vm10, %v1075_v15, 0.0  ;;  %v566_v43 = vadd.f32 %v565_v52, %v564_v44  ;;  %v933_v56 = vrot.slane %v932_v10, 2 }
 0x192   : > { %v742_v55 = vrot.slane %v741_v12, 2  ;;  %v770_v27 = vadd.f32 %v769_v48, %v768_v18  ;;  %v1090_v54 = vadd.f32 %v1089_v61, %v1088_v23  ;;  %v594_v59 = vsel %vm551_vm10, %v580_v58, 0.0 }
 0x193   : > { %v1063_v0 = vadd.f32 %v1062_v60, %v1061_v14  ;;  %v567_v50 = vrot.slane %v566_v43, 4  ;;  %v595_v4 = vadd.f32 %v594_v59, %v593_v51  ;;  %v934_v18 = vadd.f32 %v933_v56, %v932_v10 }
 0x194   : > { %v771_v11 = vrot.slane %v770_v27, 2  ;;  %v1091_v2 = vrot.slane %v1090_v54, 4  ;;  %v743_v16 = vadd.f32 %v742_v55, %v741_v12  ;;  %v906_v51 = vrot.slane %v905_v63, 1 }
 0x195   : > { %v1064_v21 = vrot.slane %v1063_v0, 2  ;;  %v568_v29 = vadd.f32 %v567_v50, %v566_v43  ;;  %v596_v46 = vrot.slane %v595_v4, 4  ;;  %v1102_v61 = vmul.f32 %v2219_v41, %v1101_v47 }
 0x196   : > { %v1092_v13 = vadd.f32 %v1091_v2, %v1090_v54  ;;  %v772_v15 = vadd.f32 %v771_v11, %v770_v27  ;;  %v744_v48 = vrot.slane %v743_v16, 1  ;;  %v935_v50 = vrot.slane %v934_v18, 1 }
 0x197   : > { %v569_v44 = vrot.slane %v568_v29, 2  ;;  %v597_v52 = vadd.f32 %v596_v46, %v595_v4  ;;  %v1065_v58 = vadd.f32 %v1064_v21, %v1063_v0  ;;  %v907_v54 = vadd.f32 %v906_v51, %v905_v63 }
 0x198   : > { %v1093_v23 = vrot.slane %v1092_v13, 2  ;;  %v773_v59 = vrot.slane %v772_v15, 1  ;;  %v745_v57 = vadd.f32 %v744_v48, %v743_v16  ;;  %v1103_v46 = vadd.f32 %v2219_v41, %v1102_v61 }
 0x199   : > { %v570_v14 = vadd.f32 %v569_v44, %v568_v29  ;;  %v598_v60 = vrot.slane %v597_v52, 2  ;;  %v1066_v9 = vrot.slane %v1065_v58, 1  ;;  %v936_v56 = vadd.f32 %v935_v50, %v934_v18 }
 0x19a   : > { %v1094_v12 = vadd.f32 %v1093_v23, %v1092_v13  ;;  %v774_v10 = vadd.f32 %v773_v59, %v772_v15  ;;  %v1105_v21 = vsel %vm1104_vm11, %v2219_v41, %v1103_v46 }
 0x19b   : > { %v571_v55 = vrot.slane %v570_v14, 1  ;;  %v599_v43 = vadd.f32 %v598_v60, %v597_v52  ;;  %v1067_v47 = vadd.f32 %v1066_v9, %v1065_v58 }
 0x19c   : > { %v1095_v29 = vrot.slane %v1094_v12, 1 }
 0x19d   : > { %v572_v45 = vadd.f32 %v571_v55, %v570_v14  ;;  %v600_v27 = vrot.slane %v599_v43, 1 }
 0x19e   : > { %v1096_v13 = vadd.f32 %v1095_v29, %v1094_v12 }
 0x19f   : > { %v601_v0 = vadd.f32 %v600_v27, %v599_v43  ;;  %v775_v4 = vadd.f32 %v745_v57, %v572_v45 }
 0x1a1   : > { %v776_v11 = vadd.f32 %v774_v10, %v601_v0  ;;  %v937_v2 = vadd.f32 %v907_v54, %v775_v4 }
 0x1a3   : > { %v938_v16 = vadd.f32 %v936_v56, %v776_v11  ;;  %v1097_v44 = vadd.f32 %v1067_v47, %v937_v2 }
 0x1a5   : > { %v1098_v52 = vadd.f32 %v1096_v13, %v938_v16  ;;  %v2259_v23 = vmul.f32 %v1105_v21, %v1097_v44 }
 0x1a7   : > { %v1107_v63 = vmul.f32 %v1105_v21, %v1098_v52  ;;  %v1108_v48 = vmul.f32 %v2259_v23, %v2259_v23  ;;  %v1129_v15 = vsub.f32 %v2247_v42, %v2259_v23  ;;  %v1193_v58 = vsub.f32 %v2177_v33, %v2259_v23 }
 0x1a8   : > { %v1225_v41 = vsub.f32 %v2240_v34, %v2259_v23  ;;  %v1224_v51 = vsub.f32 %v2210_v22, %v2259_v23  ;;  %v1223_v61 = vsub.f32 %v2169_v19, %v2259_v23  ;;  %v1127_v59 = vsub.f32 %v2179_v38, %v2259_v23 }
 0x1a9   : > { %v1109_v14 = vsub.f32 %v1107_v63, %v1108_v48  ;;  %v1128_v42 = vsub.f32 %v2217_v39, %v2259_v23  ;;  %v1156_v45 = vsub.f32 %v2048_v28, %v2259_v23  ;;  %v1155_v27 = vsub.f32 %v2040_v6, %v2259_v23 }
 0x1aa   : > { %v1154_v38 = vsub.f32 %v2032_v8, %v2259_v23  ;;  %v1159_v28 = vsub.f32 %v2160_v5, %v2259_v23  ;;  %v1158_v6 = vsub.f32 %v2110_v7, %v2259_v23  ;;  %v1157_v47 = vsub.f32 %v2060_v36, %v2259_v23 }
 0x1ab   : > { %v1110_v18 = vmax.f32 %v1109_v14, 0.0  ;;  %v1186_v36 = vsub.f32 %v2028_v37, %v2259_v23  ;;  %v1161_v63 = vsub.f32 %v2229_v31, %v2259_v23  ;;  %v1160_v48 = vsub.f32 %v2193_v20, %v2259_v23 }
 0x1ac   : > { %v1124_v37 = vsub.f32 %v2052_v30, %v2259_v23  ;;  %v1126_v30 = vsub.f32 %v2134_v40, %v2259_v23  ;;  %v1190_v39 = vsub.f32 %v2054_v32, %v2259_v23  ;;  %v1219_v32 = vsub.f32 %v2042_v25, %v2259_v23 }
 0x1ad   : > { %v1111_v60 = vadd.f32 1e-05, %v1110_v18 }
 0x1af   : > { %1595 = vrsqrt.f32 %v1111_v60  ;;  %vm1118_vm13 = vweird.f32 %v1111_v60 }
 0x1b5   : > { %v1596_v12 = vpop.eup %1595 }
 0x1b6   : > { %v1113_v55 = vmul.f32 %v1596_v12, %v1111_v60  ;;  %vm1119_vm12 = vweird.f32 %v1596_v12 }
 0x1b7   : > { %vm1120_vm14 = vmor %vm1118_vm13, %vm1119_vm12 }
 0x1b8   : > { %v1114_v43 = vmul.f32 %v1596_v12, %v1113_v55 }
 0x1ba   : > { %v1115_v50 = vmul.f32 0.5, %v1114_v43  ;;  %v1189_v43 = vsub.f32 %v2046_v26, %v2259_v23 }
 0x1bc   : > { %v1116_v57 = vsub.f32 1.5, %v1115_v50 }
 0x1be   : > { %v1117_v9 = vmul.f32 %v1596_v12, %v1116_v57 }
 0x1c0   : > { %v2283_v54 = vsel %vm1120_vm14, %v1596_v12, %v1117_v9  ;;  %v1123_v9 = vsub.f32 %v2044_v17, %v2259_v23 }
 0x1c1   : > { %v2286_v46 = vmul.f32 %v1129_v15, %v2283_v54  ;;  %v1164_v10 = vmul.f32 %v1156_v45, %v2283_v54  ;;  %v1163_v29 = vmul.f32 %v1155_v27, %v2283_v54  ;;  %v1162_v0 = vmul.f32 %v1154_v38, %v2283_v54 }
 0x1c2   : > { %v1167_v21 = vmul.f32 %v1159_v28, %v2283_v54  ;;  %v1166_v13 = vmul.f32 %v1158_v6, %v2283_v54  ;;  %v1165_v44 = vmul.f32 %v1157_v47, %v2283_v54  ;;  %v1194_v18 = vmul.f32 %v1186_v36, %v2283_v54 }
 0x1c3   : > { %v1172_v4 = vmul.f32 0.01, %v1164_v10  ;;  %v1171_v56 = vmul.f32 0.01, %v1163_v29  ;;  %v1170_v8 = vmul.f32 0.01, %v1162_v0  ;;  %v1169_v60 = vmul.f32 %v1161_v63, %v2283_v54 }
 0x1c4   : > { %v1175_v7 = vmul.f32 0.01, %v1167_v21  ;;  %v1174_v5 = vmul.f32 0.01, %v1166_v13  ;;  %v1173_v52 = vmul.f32 0.01, %v1165_v44  ;;  %v1168_v55 = vmul.f32 %v1160_v48, %v2283_v54 }
 0x1c5   : > { %v1180_v11 = vmax.f32 %v1164_v10, %v1172_v4  ;;  %v1179_v2 = vmax.f32 %v1163_v29, %v1171_v56  ;;  %v1178_v16 = vmax.f32 %v1162_v0, %v1170_v8  ;;  %v1202_v31 = vmul.f32 0.01, %v1194_v18 }
 0x1c6   : > { %v1183_v15 = vmax.f32 %v1167_v21, %v1175_v7  ;;  %v1182_v14 = vmax.f32 %v1166_v13, %v1174_v5  ;;  %v1181_v12 = vmax.f32 %v1165_v44, %v1173_v52  ;;  %v1177_v20 = vmul.f32 0.01, %v1169_v60 }
 0x1c7   : > { %1262 = vrot.lane.b32.xlu2 %v1180_v11, %s1625_s8  ;;  %1260 = vrot.lane.b32.xlu1 %v1179_v2, %s1625_s8  ;;  %v2320_v50 = vmul.f32 %v1124_v37, %v2283_v54  ;;  %v1176_v57 = vmul.f32 0.01, %v1168_v55  ;;  %v1122_v45 = vsub.f32 %v2036_v49, %v2259_v23  ;;  %v1188_v27 = vsub.f32 %v2038_v35, %v2259_v23 }
 0x1c8   : > { %1258 = vrot.lane.b32.xlu0 %v1178_v16, %s1625_s8  ;;  %v1187_v38 = vsub.f32 %v2030_v24, %v2259_v23  ;;  %v2333_v26 = vmul.f32 %v1127_v59, %v2283_v54  ;;  %v1125_v10 = vsub.f32 %v2089_v3, %v2259_v23  ;;  %v1197_v17 = vmul.f32 %v1189_v43, %v2283_v54 }
 0x1c9   : > { %v2339_v29 = vmul.f32 %v1123_v9, %v2283_v54  ;;  %v2342_v49 = vmul.f32 %v1122_v45, %v2283_v54  ;;  %v2345_v40 = vmul.f32 %v1126_v30, %v2283_v54  ;;  %v1210_v35 = vmax.f32 %v1194_v18, %v1202_v31  ;;  %v2497_v31 = vld [vmem:[#allocation2_spill] sm:$0xff] }
 0x1ca   : > { %v1185_v0 = vmax.f32 %v1169_v60, %v1177_v20  ;;  %v1196_v24 = vmul.f32 %v1188_v27, %v2283_v54  ;;  %v2349_v59 = vmul.f32 %v1125_v10, %v2283_v54  ;;  %v1184_v4 = vmax.f32 %v1168_v55, %v1176_v57  ;;  %v2495_v60 = vld [vmem:[#allocation4_spill] sm:$0xff]  ;;  %v2496_v55 = vld [vmem:[#allocation3_spill] sm:$0xff] }
 0x1cb   : > { %v1195_v3 = vmul.f32 %v1187_v38, %v2283_v54  ;;  %v2356_v56 = vmul.f32 %v1128_v42, %v2283_v54  ;;  %v1205_v28 = vmul.f32 0.01, %v1197_v17  ;;  %v1192_v47 = vsub.f32 %v2140_v53, %v2259_v23 }
 0x1cc   : > { %v1204_v6 = vmul.f32 0.01, %v1196_v24  ;;  %v1191_v11 = vsub.f32 %v2097_v62, %v2259_v23  ;;  %v1198_v44 = vmul.f32 %v1190_v39, %v2283_v54  ;;  %v1218_v5 = vsub.f32 %v2034_v1, %v2259_v23 }
 0x1cd   : > { %v1203_v8 = vmul.f32 0.01, %v1195_v3  ;;  %v1213_v42 = vmax.f32 %v1197_v17, %v1205_v28  ;;  %v1200_v21 = vmul.f32 %v1192_v47, %v2283_v54  ;;  %v1227_v63 = vmul.f32 %v1219_v32, %v2283_v54 }
 0x1ce   : > { %v1212_v2 = vmax.f32 %v1196_v24, %v1204_v6  ;;  %v1199_v13 = vmul.f32 %v1191_v11, %v2283_v54  ;;  %v1206_v7 = vmul.f32 0.01, %v1198_v44  ;;  %v1226_v48 = vmul.f32 %v1218_v5, %v2283_v54 }
 0x1cf   : > { %1268 = vrot.lane.b32.xlu2 %v1183_v15, %s1625_s8  ;;  %1266 = vrot.lane.b32.xlu1 %v1182_v14, %s1625_s8  ;;  %v1211_v16 = vmax.f32 %v1195_v3, %v1203_v8  ;;  %v1208_v53 = vmul.f32 0.01, %v1200_v21  ;;  %v1201_v14 = vmul.f32 %v1193_v58, %v2283_v54  ;;  %v1235_v25 = vmul.f32 0.01, %v1227_v63 }
 0x1d0   : > { %1264 = vrot.lane.b32.xlu0 %v1181_v12, %s1625_s8  ;;  %v1207_v62 = vmul.f32 0.01, %v1199_v13  ;;  %v1214_v15 = vmax.f32 %v1198_v44, %v1206_v7  ;;  %v1234_v1 = vmul.f32 0.01, %v1226_v48  ;;  %v1222_v12 = vsub.f32 %v2495_v60, %v2259_v23 }
 0x1d1   : > { %v1216_v52 = vmax.f32 %v1200_v21, %v1208_v53  ;;  %v1209_v18 = vmul.f32 0.01, %v1201_v14  ;;  %v1221_v37 = vsub.f32 %v2496_v55, %v2259_v23  ;;  %v1220_v20 = vsub.f32 %v2497_v31, %v2259_v23 }
 0x1d2   : > { %v1215_v36 = vmax.f32 %v1199_v13, %v1207_v62  ;;  %v1243_v33 = vmax.f32 %v1227_v63, %v1235_v25  ;;  %v1242_v58 = vmax.f32 %v1226_v48, %v1234_v1  ;;  %v1230_v43 = vmul.f32 %v1222_v12, %v2283_v54 }
 0x1d3   : > { %v1229_v57 = vmul.f32 %v1221_v37, %v2283_v54  ;;  %v1217_v9 = vmax.f32 %v1201_v14, %v1209_v18  ;;  %v1228_v45 = vmul.f32 %v1220_v20, %v2283_v54  ;;  %v1139_v21 = vmul.f32 0.01, %v2339_v29 }
 0x1d4   : > { %v1238_v30 = vmul.f32 0.01, %v1230_v43  ;;  %v1142_v32 = vmul.f32 0.01, %v2345_v40  ;;  %v1145_v25 = vmul.f32 0.01, %v2286_v46 }
 0x1d5   : > { %v1237_v27 = vmul.f32 0.01, %v1229_v57  ;;  %v1236_v38 = vmul.f32 0.01, %v1228_v45  ;;  %v1141_v12 = vmul.f32 0.01, %v2349_v59 }
 0x1d6   : > { %v1246_v10 = vmax.f32 %v1230_v43, %v1238_v30  ;;  %v1144_v30 = vmul.f32 0.01, %v2356_v56 }
 0x1d7   : > { %1290 = vrot.lane.b32.xlu2 %v1210_v35, %s1622_s18  ;;  %1272 = vrot.lane.b32.xlu1 %v1185_v0, %s1625_s8  ;;  %v1245_v17 = vmax.f32 %v1229_v57, %v1237_v27  ;;  %v1233_v35 = vmul.f32 %v1225_v41, %v2283_v54  ;;  %v1232_v0 = vmul.f32 %v1224_v51, %v2283_v54 }
 0x1d8   : > { %1270 = vrot.lane.b32.xlu0 %v1184_v4, %s1625_s8  ;;  %v1244_v24 = vmax.f32 %v1228_v45, %v1236_v38  ;;  %v1231_v4 = vmul.f32 %v1223_v61, %v2283_v54 }
 0x1d9   : > { %v1241_v3 = vmul.f32 0.01, %v1233_v35  ;;  %v1240_v28 = vmul.f32 0.01, %v1232_v0 }
 0x1da   : > { %v1239_v6 = vmul.f32 0.01, %v1231_v4 }
 0x1db   : > { %v1249_v8 = vmax.f32 %v1233_v35, %v1241_v3  ;;  %v1248_v34 = vmax.f32 %v1232_v0, %v1240_v28  ;;  %v1143_v0 = vmul.f32 0.01, %v2333_v26 }
 0x1dc   : > { %v1247_v41 = vmax.f32 %v1231_v4, %v1239_v6 }
 0x1dd   : > { %v1151_v3 = vmax.f32 %v2333_v26, %v1143_v0 }
 0x1df   : > { %1296 = vrot.lane.b32.xlu2 %v1213_v42, %s1622_s18  ;;  %1294 = vrot.lane.b32.xlu1 %v1212_v2, %s1622_s18 }
 0x1e0   : > { %1292 = vrot.lane.b32.xlu0 %v1211_v16, %s1622_s18  ;;  %v1147_v16 = vmax.f32 %v2339_v29, %v1139_v21  ;;  %v1138_v29 = vmul.f32 0.01, %v2342_v49 }
 0x1e2   : > { %v1146_v1 = vmax.f32 %v2342_v49, %v1138_v29  ;;  %v1140_v49 = vmul.f32 0.01, %v2320_v50 }
 0x1e4   : > { %v1148_v45 = vmax.f32 %v2320_v50, %v1140_v49 }
 0x1e7   : > { %1302 = vrot.lane.b32.xlu2 %v1216_v52, %s1622_s18  ;;  %1300 = vrot.lane.b32.xlu1 %v1215_v36, %s1622_s18  ;;  %v1150_v52 = vmax.f32 %v2345_v40, %v1142_v32  ;;  %v1153_v40 = vmax.f32 %v2286_v46, %v1145_v25  ;;  %v1149_v46 = vmax.f32 %v2349_v59, %v1141_v12 }
 0x1e8   : > { %1298 = vrot.lane.b32.xlu0 %v1214_v15, %s1622_s18 }
 0x1ef   : > { %1324 = vrot.lane.b32.xlu2 %v1243_v33, %s1626_s13  ;;  %1322 = vrot.lane.b32.xlu1 %v1242_v58, %s1626_s13 }
 0x1f0   : > { %1304 = vrot.lane.b32.xlu0 %v1217_v9, %s1622_s18 }
 0x1f7   : > { %1330 = vrot.lane.b32.xlu2 %v1246_v10, %s1626_s13  ;;  %1328 = vrot.lane.b32.xlu1 %v1245_v17, %s1626_s13 }
 0x1f8   : > { %1326 = vrot.lane.b32.xlu0 %v1244_v24, %s1626_s13  ;;  %v1152_v24 = vmax.f32 %v2356_v56, %v1144_v30 }
 0x1ff   : > { %1336 = vrot.lane.b32.xlu2 %v1249_v8, %s1626_s13  ;;  %1334 = vrot.lane.b32.xlu1 %v1248_v34, %s1626_s13 }
 0x200   : > { %1332 = vrot.lane.b32.xlu0 %v1247_v41, %s1626_s13 }
 0x221   : > { %v1263_v22 = vpop.permute.xlu2 %1262 }
 0x222   : > { %v1348_v27 = vsel %vm551_vm10, %v1148_v45, %v1263_v22 }
 0x229   : > { %v2408_v51 = vpop.permute.xlu2 %1268 }
 0x22a   : > { %v1351_v28 = vsel %vm551_vm10, %v1151_v3, %v2408_v51 }
 0x231   : > { %v1291_v47 = vpop.permute.xlu2 %1290 }
 0x239   : > { %v1261_v11 = vpop.permute.xlu1 %1260  ;;  %v1297_v23 = vpop.permute.xlu2 %1296 }
 0x23a   : > { %v1259_v19 = vpop.permute.xlu0 %1258  ;;  %v1347_v53 = vsel %vm551_vm10, %v1147_v16, %v1261_v11 }
 0x23b   : > { %v1346_v60 = vsel %vm551_vm10, %v1146_v1, %v1259_v19 }
 0x23c   : > { %v1354_v37 = vsel %vm466_vm6, %v1346_v60, %v1291_v47 }
 0x241   : > { %v1267_v61 = vpop.permute.xlu1 %1266  ;;  %v1303_v39 = vpop.permute.xlu2 %1302 }
 0x242   : > { %v1265_v54 = vpop.permute.xlu0 %1264  ;;  %v1350_v48 = vsel %vm551_vm10, %v1150_v52, %v1267_v61 }
 0x243   : > { %v1349_v9 = vsel %vm551_vm10, %v1149_v46, %v1265_v54 }
 0x244   : > { %v1357_v10 = vsel %vm466_vm6, %v1349_v9, %v1297_v23 }
 0x249   : > { %v1273_v42 = vpop.permute.xlu1 %1272  ;;  %v1325_v13 = vpop.permute.xlu2 %1324 }
 0x24a   : > { %v1271_v2 = vpop.permute.xlu0 %1270  ;;  %v1353_v31 = vsel %vm551_vm10, %v1153_v40, %v1273_v42 }
 0x24b   : > { %v1352_v4 = vsel %vm551_vm10, %v1152_v24, %v1271_v2 }
 0x24c   : > { %v1360_v8 = vsel %vm466_vm6, %v1352_v4, %v1303_v39 }
 0x251   : > { %v1295_v44 = vpop.permute.xlu1 %1294  ;;  %v1331_v36 = vpop.permute.xlu2 %1330 }
 0x252   : > { %v1293_v62 = vpop.permute.xlu0 %1292  ;;  %v1356_v17 = vsel %vm466_vm6, %v1348_v27, %v1295_v44 }
 0x253   : > { %v1355_v7 = vsel %vm466_vm6, %v1347_v53, %v1293_v62 }
 0x254   : > { %v1364_v5 = vsel %vm1362_vm15, %v1355_v7, %v1325_v13 }
 0x255   : > { %1372 = vst.msk [vmem:[%s2417_s17 + $0x8] sm:$0xff] %vm479_vm7, %v1364_v5 }
 0x259   : > { %v1301_v63 = vpop.permute.xlu1 %1300  ;;  %v1337_v58 = vpop.permute.xlu2 %1336 }
 0x25a   : > { %v1299_v15 = vpop.permute.xlu0 %1298  ;;  %v1359_v34 = vsel %vm466_vm6, %v1351_v28, %v1301_v63 }
 0x25b   : > { %v1358_v14 = vsel %vm466_vm6, %v1350_v48, %v1299_v15 }
 0x25c   : > { %v1367_v18 = vsel %vm1362_vm15, %v1358_v14, %v1331_v36 }
 0x25d   : > { %1375 = vst.msk [vmem:[%s2417_s17 + $0x20] sm:$0xff] %vm479_vm7, %v1367_v18 }
 0x261   : > { %v1323_v55 = vpop.permute.xlu1 %1322 }
 0x262   : > { %v1363_v20 = vsel %vm1362_vm15, %v1354_v37, %v1323_v55  ;;  %v1305_v33 = vpop.permute.xlu0 %1304 }
 0x263   : > { %1371 = vst.msk [vmem:[%s2417_s17] sm:$0xff] %vm479_vm7, %v1363_v20  ;;  %v1361_v43 = vsel %vm466_vm6, %v1353_v31, %v1305_v33 }
 0x264   : > { %v1370_v57 = vsel %vm1362_vm15, %v1361_v43, %v1337_v58 }
 0x265   : > { %1378 = vst.msk [vmem:[%s2417_s17 + $0x38] sm:$0xff] %vm479_vm7, %v1370_v57 }
 0x269   : > { %v1329_v38 = vpop.permute.xlu1 %1328 }
 0x26a   : > { %v1366_v59 = vsel %vm1362_vm15, %v1357_v10, %v1329_v38  ;;  %v1327_v35 = vpop.permute.xlu0 %1326 }
 0x26b   : > { %1374 = vst.msk [vmem:[%s2417_s17 + $0x18] sm:$0xff] %vm479_vm7, %v1366_v59  ;;  %v1365_v50 = vsel %vm1362_vm15, %v1356_v17, %v1327_v35 }
 0x26c   : > { %1373 = vst.msk [vmem:[%s2417_s17 + $0x10] sm:$0xff] %vm479_vm7, %v1365_v50 }
 0x271   : > { %v1335_v6 = vpop.permute.xlu1 %1334 }
 0x272   : > { %v1369_v41 = vsel %vm1362_vm15, %v1360_v8, %v1335_v6  ;;  %v1333_v22 = vpop.permute.xlu0 %1332 }
 0x273   : > { %1377 = vst.msk [vmem:[%s2417_s17 + $0x30] sm:$0xff] %vm479_vm7, %v1369_v41  ;;  %v1368_v56 = vsel %vm1362_vm15, %v1359_v34, %v1333_v22 }
 0x274   : > { %1376 = vst.msk [vmem:[%s2417_s17 + $0x28] sm:$0xff] %vm479_vm7, %v1368_v56 }
 0x275 PF: > { %s12_s11 = sadd.s32 1, %s1619_s11   ;;  %s2498_s9 = smov %s1615_s10 }
 0x276   : > { %p9_p5 = scmp.ge.s32.totalorder %s12_s11, 4   ;;  %s2499_s10 = smov %s2501_s12 }
 0x278   :  { %11 = sbr.rel (!%p9_p5) target bundleno = 2 (0x2), region = 64 }

</bundles_post_ra>
